<compile_context>
chip_gen: v7x
topology: tpu7x:2x2x1
jax: 0.10.0
libtpu: 0.0.40
codegen_flags: <defaults>
</compile_context>

<pallas_src>
import math

import jax
import jax.numpy as jnp
from jax.experimental import pallas as pl
from jax.experimental.pallas import tpu as pltpu

_LN_EPS = 1e-5  # torch.nn.LayerNorm default


# ----------------------------------------------------------------- helpers ---

def _erf(x):
    # Abramowitz & Stegun 7.1.26 (max abs err ~1.5e-7 => fp32-exact for our use).
    # Used in-kernel instead of lax.erf to avoid relying on erf lowering support.
    # The exp() goes to the EUP slot; the short polynomial is cheap VPU work and
    # is NOT the binding unit at these shapes (matches torch's exact GELU).
    a1, a2, a3, a4, a5 = 0.254829592, -0.284496736, 1.421413741, -1.453152027, 1.061405429
    p = 0.3275911
    s = jnp.where(x >= 0, 1.0, -1.0)
    ax = jnp.abs(x)
    t = 1.0 / (1.0 + p * ax)
    poly = ((((a5 * t + a4) * t + a3) * t + a2) * t + a1) * t
    return s * (1.0 - poly * jnp.exp(-ax * ax))


def _gelu(x):
    # exact (erf-based) GELU, matching torch.nn.GELU(approximate='none')
    return 0.5 * x * (1.0 + _erf(x * (1.0 / math.sqrt(2.0))))


def _layernorm(x, g, b):
    mu = jnp.mean(x, axis=-1, keepdims=True)
    var = jnp.mean((x - mu) ** 2, axis=-1, keepdims=True)
    return (x - mu) * jax.lax.rsqrt(var + _LN_EPS) * g + b


def _mm_hi(a, b):
    # reference-only matmul at explicit highest precision (f32-exact on TPU)
    return jnp.matmul(a, b, precision=jax.lax.Precision.HIGHEST)


# ------------------------------------------------------------ fused kernel ---

def _gfnet_fused_kernel(p_ref, pew_ref, peb_ref, fcat_ref, gcat_ref,
                        wr_ref, wi_ref, g1_ref, b1_ref, g2_ref, b2_ref,
                        w1_ref, bb1_ref, w2_ref, bb2_ref, hw_ref, hb_ref,
                        o_ref, x_acc):
    # grid = (B, depth); one image per i, one GFNet Block per d.
    d = pl.program_id(1)
    F = wr_ref.shape[1]                                  # number of rfft2 coefficients

    # ---- d == 0 prologue: patch embedding for this image -> resident stream ----
    @pl.when(d == 0)
    def _():
        x_acc[...] = (jnp.dot(p_ref[0], pew_ref[...],
                              preferred_element_type=jnp.float32) + peb_ref[...])

    x = x_acc[...]                                        # (N, C) residual stream

    # ---- norm1 + GlobalFilter (rfft2 -> complex weight -> irfft2, ortho) ----
    xn = _layernorm(x, g1_ref[0], b1_ref[0])
    xf = jnp.dot(fcat_ref[...], xn,
                 preferred_element_type=jnp.float32)      # (2F, C) = [Re(X); Im(X)]
    xr = xf[:F]
    xi = xf[F:]
    wr = wr_ref[0]
    wi = wi_ref[0]
    ycat = jnp.concatenate([xr * wr - xi * wi,            # Re(X * W)
                            xr * wi + xi * wr], axis=0)   # Im(X * W)   -> (2F, C)
    xflt = jnp.dot(gcat_ref[...], ycat,
                   preferred_element_type=jnp.float32)    # (N, C) irfft2 result

    # ---- norm2 + MLP (fc1 -> GELU -> fc2) + residual ----
    xn2 = _layernorm(xflt, g2_ref[0], b2_ref[0])
    h = jnp.dot(xn2, w1_ref[0], preferred_element_type=jnp.float32) + bb1_ref[0]
    h = _gelu(h)
    mlp = jnp.dot(h, w2_ref[0], preferred_element_type=jnp.float32) + bb2_ref[0]
    x_new = x + mlp
    x_acc[...] = x_new

    # ---- d == depth-1 epilogue: token mean + classification head ----
    @pl.when(d == pl.num_programs(1) - 1)
    def _():
        xm = jnp.mean(x_new, axis=0, keepdims=True)                       # (1, C)
        o_ref[0] = (jnp.dot(xm, hw_ref[...],
                            preferred_element_type=jnp.float32) + hb_ref[...])


# ------------------------------------------------------------ pallas glue ---

def _rep_spec(shape):
    n = len(shape)
    return pl.BlockSpec(shape, lambda i, d, _n=n: (0,) * _n)


def _depth_spec(shape):
    rest = len(shape) - 1
    return pl.BlockSpec((1,) + tuple(shape[1:]),
                        lambda i, d, _r=rest: (d,) + (0,) * _r)


def gfnet_forward_pallas(x_img, prep):
    patch = prep["patch"]
    depth = prep["depth"]
    B, Cin, H, W = x_img.shape
    a, b = H // patch, W // patch
    N = a * b
    K = Cin * patch * patch
    E = prep["pe_w"].shape[1]
    hidden = prep["w1"].shape[2]
    F2 = prep["Fcat"].shape[0]
    Fh = F2 // 2
    ncls = prep["head_w"].shape[1]

    patches = extract_patches(x_img.astype(jnp.float32), patch)       # (B, N, K)

    in_specs = [
        pl.BlockSpec((1, N, K), lambda i, d: (i, 0, 0)),              # patches (per image)
        _rep_spec((K, E)),                                            # patch-embed weight
        _rep_spec((1, E)),                                            # patch-embed bias
        _rep_spec((F2, N)),                                           # [Fr; Fi]
        _rep_spec((N, F2)),                                           # [GrT | GiT]
        _depth_spec((depth, Fh, E)),                                  # Wr (per layer)
        _depth_spec((depth, Fh, E)),                                  # Wi (per layer)
        _depth_spec((depth, 1, E)),                                   # norm1 gamma
        _depth_spec((depth, 1, E)),                                   # norm1 beta
        _depth_spec((depth, 1, E)),                                   # norm2 gamma
        _depth_spec((depth, 1, E)),                                   # norm2 beta
        _depth_spec((depth, E, hidden)),                              # fc1 weight (C, H)
        _depth_spec((depth, 1, hidden)),                              # fc1 bias
        _depth_spec((depth, hidden, E)),                              # fc2 weight (H, C)
        _depth_spec((depth, 1, E)),                                   # fc2 bias
        _rep_spec((E, ncls)),                                         # head weight
        _rep_spec((1, ncls)),                                         # head bias
    ]

    out = pl.pallas_call(
        _gfnet_fused_kernel,
        out_shape=jax.ShapeDtypeStruct((B, 1, ncls), jnp.float32),
        grid=(B, depth),
        in_specs=in_specs,
        out_specs=pl.BlockSpec((1, 1, ncls), lambda i, d: (i, 0, 0)),
        scratch_shapes=[pltpu.VMEM((N, E), jnp.float32)],             # resident activation
        compiler_params=pltpu.CompilerParams(
            dimension_semantics=("parallel", "arbitrary")),
    )(patches, prep["pe_w"], prep["pe_b"], prep["Fcat"], prep["Gcat"],
      prep["wr"], prep["wi"], prep["g1"], prep["b1"], prep["g2"], prep["b2"],
      prep["w1"], prep["bb1"], prep["w2"], prep["bb2"],
      prep["head_w"], prep["head_b"])
    return out.reshape(B, ncls)


# ------------------------------------------------------- DFT matrix setup ---

def make_dft_mats(a, b):
    """Real matrices implementing rfft2 / irfft2 (norm='ortho') over an (a, b) grid.

    Forward:  X = (Fr + i*Fi) @ x_flat          (F = a*(b//2+1), N = a*b)
    Inverse:  y_flat = GrT @ Re(X) + GiT @ Im(X)
    The irfft handling (Hermitian fold, DC/Nyquist imag parts dropped) matches
    numpy/torch semantics.
    """
    w = b // 2 + 1
    k1 = jnp.arange(a, dtype=jnp.float32)
    k2 = jnp.arange(w, dtype=jnp.float32)
    n1 = jnp.arange(a, dtype=jnp.float32)
    n2 = jnp.arange(b, dtype=jnp.float32)
    ph1 = 2.0 * math.pi * jnp.outer(k1, n1) / a                 # (a, a)
    ph2 = 2.0 * math.pi * jnp.outer(k2, n2) / b                 # (w, b)
    phase = ph1[:, None, :, None] + ph2[None, :, None, :]       # (a, w, a, b)
    scale = 1.0 / math.sqrt(a * b)
    Fr = (jnp.cos(phase) * scale).reshape(a * w, a * b)
    Fi = (-jnp.sin(phase) * scale).reshape(a * w, a * b)
    # Hermitian-fold coefficients for the inverse real transform (DC and, for
    # even b, Nyquist columns counted once).
    c = jnp.full((w,), 2.0, dtype=jnp.float32)
    c = c.at[0].set(1.0)
    if b % 2 == 0:
        c = c.at[w - 1].set(1.0)
    coef = c[None, :, None, None] * scale
    GrT = (jnp.cos(phase) * coef).reshape(a * w, a * b).T        # (a*b, a*w)
    GiT = (-jnp.sin(phase) * coef).reshape(a * w, a * b).T
    return {"Fr": Fr, "Fi": Fi, "GrT": GrT, "GiT": GiT}


def extract_patches(x, patch):
    # NCHW -> (B, N, Cin*patch*patch), flattened in (c, pi, pj) order to match
    # the Conv2d(kernel=stride=patch) weight layout (im2col form of PatchEmbed).
    B, Cin, H, W = x.shape
    gh, gw = H // patch, W // patch
    x = x.reshape(B, Cin, gh, patch, gw, patch)
    x = x.transpose(0, 2, 4, 1, 3, 5)                            # (B, gh, gw, Cin, p, p)
    return x.reshape(B, gh * gw, Cin * patch * patch)


# --------------------------------------------------------------- parameters ---

def init_params(key, *, img, patch, cin, embed, mlp_ratio, depth, ncls):
    a = img // patch
    w = a // 2 + 1
    hidden = int(embed * mlp_ratio)
    kpw, kpb, khw, khb, kblk = jax.random.split(key, 5)
    params = {
        "patch_w": jax.random.normal(kpw, (embed, cin, patch, patch), jnp.float32)
                   * (1.0 / math.sqrt(cin * patch * patch)),
        "patch_b": jax.random.normal(kpb, (embed,), jnp.float32) * 0.02,
        "head_w": jax.random.normal(khw, (ncls, embed), jnp.float32)
                  * (1.0 / math.sqrt(embed)),
        "head_b": jax.random.normal(khb, (ncls,), jnp.float32) * 0.02,
        "blocks": [],
    }
    for d in range(depth):
        kcw, k1, kb1, k2, kb2 = jax.random.split(jax.random.fold_in(kblk, d), 5)
        params["blocks"].append({
            "g1": jnp.ones((embed,), jnp.float32),
            "b1": jnp.zeros((embed,), jnp.float32),
            "cw": jax.random.normal(kcw, (a, w, embed, 2), jnp.float32) * 0.02,
            "g2": jnp.ones((embed,), jnp.float32),
            "b2": jnp.zeros((embed,), jnp.float32),
            "fc1_w": jax.random.normal(k1, (hidden, embed), jnp.float32)
                     * (1.0 / math.sqrt(embed)),
            "fc1_b": jax.random.normal(kb1, (hidden,), jnp.float32) * 0.02,
            "fc2_w": jax.random.normal(k2, (embed, hidden), jnp.float32)
                     * (1.0 / math.sqrt(hidden)),
            "fc2_b": jax.random.normal(kb2, (embed,), jnp.float32) * 0.02,
        })
    return params


def prepare_gfnet(params, *, img, patch):
    # One-time host-side preparation: DFT matrices (hoisted out of the forward),
    # operand concatenation, weight transposition and depth-stacking.
    a = b = img // patch
    E = params["patch_w"].shape[0]
    Cin = params["patch_w"].shape[1]
    K = Cin * patch * patch
    F = a * (b // 2 + 1)
    dft = make_dft_mats(a, b)
    blocks = params["blocks"]
    prep = {
        "pe_w": params["patch_w"].reshape(E, K).T,                         # (K, E)
        "pe_b": params["patch_b"].reshape(1, E),
        "Fcat": jnp.concatenate([dft["Fr"], dft["Fi"]], axis=0),           # (2F, N)
        "Gcat": jnp.concatenate([dft["GrT"], dft["GiT"]], axis=1),         # (N, 2F)
        "wr": jnp.stack([blk["cw"][..., 0].reshape(F, E) for blk in blocks]),
        "wi": jnp.stack([blk["cw"][..., 1].reshape(F, E) for blk in blocks]),
        "g1": jnp.stack([blk["g1"].reshape(1, E) for blk in blocks]),
        "b1": jnp.stack([blk["b1"].reshape(1, E) for blk in blocks]),
        "g2": jnp.stack([blk["g2"].reshape(1, E) for blk in blocks]),
        "b2": jnp.stack([blk["b2"].reshape(1, E) for blk in blocks]),
        "w1": jnp.stack([blk["fc1_w"].T for blk in blocks]),               # (depth, E, hidden)
        "bb1": jnp.stack([blk["fc1_b"].reshape(1, -1) for blk in blocks]),
        "w2": jnp.stack([blk["fc2_w"].T for blk in blocks]),               # (depth, hidden, E)
        "bb2": jnp.stack([blk["fc2_b"].reshape(1, E) for blk in blocks]),
        "head_w": params["head_w"].T,                                      # (E, ncls)
        "head_b": params["head_b"].reshape(1, -1),
        "patch": patch,
        "depth": len(blocks),
    }
    return prep


# ---------------------------------------------------------------- reference ---

def gfnet_forward_reference(x_img, params, *, patch):
    # Pure-JAX reference mirroring the PyTorch module (jnp.fft, exact erf GELU,
    # explicit highest-precision matmuls).
    B, Cin, H, W = x_img.shape
    a, b = H // patch, W // patch
    E = params["patch_w"].shape[0]
    K = Cin * patch * patch
    patches = extract_patches(x_img.astype(jnp.float32), patch)
    x = _mm_hi(patches, params["patch_w"].reshape(E, K).T) + params["patch_b"]
    for blk in params["blocks"]:
        xn = _layernorm(x, blk["g1"], blk["b1"])
        Bx, N, C = xn.shape
        xs = xn.reshape(Bx, a, b, C)
        Xf = jnp.fft.rfft2(xs, axes=(1, 2), norm="ortho")
        wc = blk["cw"][..., 0] + 1j * blk["cw"][..., 1]
        xs = jnp.fft.irfft2(Xf * wc, s=(a, b), axes=(1, 2), norm="ortho")
        xf = xs.reshape(Bx, N, C).astype(jnp.float32)
        xn2 = _layernorm(xf, blk["g2"], blk["b2"])
        h = _mm_hi(xn2, blk["fc1_w"].T) + blk["fc1_b"]
        h = 0.5 * h * (1.0 + jax.lax.erf(h / math.sqrt(2.0)))
        x = x + (_mm_hi(h, blk["fc2_w"].T) + blk["fc2_b"])
    x = x.mean(axis=1)
    return _mm_hi(x, params["head_w"].T) + params["head_b"]


# ------------------------------------------------------------------- main ---

if __name__ == "__main__":
    # Small shapes consistent with the module: grid = 32/4 = 8x8 -> N=64, h=8, w=5.
    B, CIN, IMG, PATCH = 2, 3, 32, 4
    EMBED, MLP_RATIO, DEPTH, NCLS = 32, 4, 2, 16

    key = jax.random.PRNGKey(0)
    kx, kp = jax.random.split(key)
    x_img = jax.random.normal(kx, (B, CIN, IMG, IMG), dtype=jnp.float32)
    params = init_params(kp, img=IMG, patch=PATCH, cin=CIN, embed=EMBED,
                         mlp_ratio=MLP_RATIO, depth=DEPTH, ncls=NCLS)

    prep = prepare_gfnet(params, img=IMG, patch=PATCH)   # one-time setup (DFT mats, stacking)

    out = jax.block_until_ready(gfnet_forward_pallas(x_img, prep))

    ref = jax.block_until_ready(gfnet_forward_reference(x_img, params, patch=PATCH))
    err = float(jnp.max(jnp.abs(out - ref)))
    scale = float(jnp.max(jnp.abs(ref))) + 1.0
    assert out.shape == (B, NCLS), out.shape
    assert err <= 1e-2 * scale, f"mismatch vs reference: max abs err {err} (scale {scale})"

    print("KERNEL_OK")
</pallas_src>

<mosaic_0001>
module attributes {stable_mosaic.version = 11 : i64} {
  func.func @_gfnet_fused_kernel(%arg0: i32, %arg1: i32, %arg2: memref<1x64x48xf32, #tpu.memory_space<vmem>>, %arg3: memref<48x32xf32, #tpu.memory_space<vmem>>, %arg4: memref<1x32xf32, #tpu.memory_space<vmem>>, %arg5: memref<80x64xf32, #tpu.memory_space<vmem>>, %arg6: memref<64x80xf32, #tpu.memory_space<vmem>>, %arg7: memref<1x40x32xf32, #tpu.memory_space<vmem>>, %arg8: memref<1x40x32xf32, #tpu.memory_space<vmem>>, %arg9: memref<1x1x32xf32, #tpu.memory_space<vmem>>, %arg10: memref<1x1x32xf32, #tpu.memory_space<vmem>>, %arg11: memref<1x1x32xf32, #tpu.memory_space<vmem>>, %arg12: memref<1x1x32xf32, #tpu.memory_space<vmem>>, %arg13: memref<1x32x128xf32, #tpu.memory_space<vmem>>, %arg14: memref<1x1x128xf32, #tpu.memory_space<vmem>>, %arg15: memref<1x128x32xf32, #tpu.memory_space<vmem>>, %arg16: memref<1x1x32xf32, #tpu.memory_space<vmem>>, %arg17: memref<32x16xf32, #tpu.memory_space<vmem>>, %arg18: memref<1x16xf32, #tpu.memory_space<vmem>>, %arg19: memref<1x1x16xf32, #tpu.memory_space<vmem>>, %arg20: memref<64x32xf32, #tpu.memory_space<vmem>>) attributes {dimension_semantics = [#tpu.dimension_semantics<parallel>, #tpu.dimension_semantics<arbitrary>], iteration_bounds = array<i64: 2, 2>, scalar_prefetch = 0 : i64, scratch_operands = 1 : i64, tpu.core_type = #tpu.core_type<tc>, window_params = [{transform_indices = @transform_0, window_bounds = array<i64: 1, 64, 48>}, {pipeline_mode = #tpu.pipeline_mode<synchronous>, transform_indices = @transform_1, window_bounds = array<i64: 48, 32>}, {pipeline_mode = #tpu.pipeline_mode<synchronous>, transform_indices = @transform_2, window_bounds = array<i64: 1, 32>}, {pipeline_mode = #tpu.pipeline_mode<synchronous>, transform_indices = @transform_3, window_bounds = array<i64: 80, 64>}, {pipeline_mode = #tpu.pipeline_mode<synchronous>, transform_indices = @transform_4, window_bounds = array<i64: 64, 80>}, {transform_indices = @transform_5, window_bounds = array<i64: 1, 40, 32>}, {transform_indices = @transform_6, window_bounds = array<i64: 1, 40, 32>}, {transform_indices = @transform_7, window_bounds = array<i64: 1, 1, 32>}, {transform_indices = @transform_8, window_bounds = array<i64: 1, 1, 32>}, {transform_indices = @transform_9, window_bounds = array<i64: 1, 1, 32>}, {transform_indices = @transform_10, window_bounds = array<i64: 1, 1, 32>}, {transform_indices = @transform_11, window_bounds = array<i64: 1, 32, 128>}, {transform_indices = @transform_12, window_bounds = array<i64: 1, 1, 128>}, {transform_indices = @transform_13, window_bounds = array<i64: 1, 128, 32>}, {transform_indices = @transform_14, window_bounds = array<i64: 1, 1, 32>}, {pipeline_mode = #tpu.pipeline_mode<synchronous>, transform_indices = @transform_15, window_bounds = array<i64: 32, 16>}, {pipeline_mode = #tpu.pipeline_mode<synchronous>, transform_indices = @transform_16, window_bounds = array<i64: 1, 16>}, {transform_indices = @transform_17, window_bounds = array<i64: 1, 1, 16>}]} {
    %c0_i32 = arith.constant 0 : i32
    %0 = arith.cmpi eq, %arg1, %c0_i32 : i32
    %1 = arith.extui %0 : i1 to i32
    %c0_i32_0 = arith.constant 0 : i32
    %2 = arith.cmpi ne, %1, %c0_i32_0 : i32
    scf.if %2 {
      %c0_68 = arith.constant 0 : index
      %c0_69 = arith.constant 0 : index
      %c0_70 = arith.constant 0 : index
      %133 = vector.load %arg2[%c0_68, %c0_69, %c0_70] : memref<1x64x48xf32, #tpu.memory_space<vmem>>, vector<1x64x48xf32>
      %134 = vector.shape_cast %133 : vector<1x64x48xf32> to vector<64x48xf32>
      %c0_71 = arith.constant 0 : index
      %c0_72 = arith.constant 0 : index
      %135 = vector.load %arg3[%c0_71, %c0_72] : memref<48x32xf32, #tpu.memory_space<vmem>>, vector<48x32xf32>
      %cst_73 = arith.constant dense<0.000000e+00> : vector<64x32xf32>
      %136 = tpu.matmul %134, %135, %cst_73 {dimension_numbers = #tpu.dot_dimension_numbers<[1], [0], [0], [1], [0, 0, 1, 1], [], []>} : vector<64x48xf32>, vector<48x32xf32>, vector<64x32xf32> -> vector<64x32xf32>
      %c0_74 = arith.constant 0 : index
      %c0_75 = arith.constant 0 : index
      %137 = vector.load %arg4[%c0_74, %c0_75] : memref<1x32xf32, #tpu.memory_space<vmem>>, vector<1x32xf32>
      %138 = vector.broadcast %137 : vector<1x32xf32> to vector<64x32xf32>
      %139 = arith.addf %136, %138 : vector<64x32xf32>
      %c0_76 = arith.constant 0 : index
      %c0_77 = arith.constant 0 : index
      %140 = vector.load %arg20[%c0_76, %c0_77] : memref<64x32xf32, #tpu.memory_space<vmem>>, vector<64x32xf32>
      tpu.vector_store %arg20[%c0_76, %c0_77], %139 {strides = array<i32>} : memref<64x32xf32, #tpu.memory_space<vmem>>, vector<64x32xf32>,
    } else {
    }
    %c0 = arith.constant 0 : index
    %c0_1 = arith.constant 0 : index
    %3 = vector.load %arg20[%c0, %c0_1] : memref<64x32xf32, #tpu.memory_space<vmem>>, vector<64x32xf32>
    %c0_2 = arith.constant 0 : index
    %c0_3 = arith.constant 0 : index
    %c0_4 = arith.constant 0 : index
    %4 = vector.load %arg9[%c0_2, %c0_3, %c0_4] : memref<1x1x32xf32, #tpu.memory_space<vmem>>, vector<1x1x32xf32>
    %5 = vector.shape_cast %4 : vector<1x1x32xf32> to vector<1x32xf32>
    %c0_5 = arith.constant 0 : index
    %c0_6 = arith.constant 0 : index
    %c0_7 = arith.constant 0 : index
    %6 = vector.load %arg10[%c0_5, %c0_6, %c0_7] : memref<1x1x32xf32, #tpu.memory_space<vmem>>, vector<1x1x32xf32>
    %7 = vector.shape_cast %6 : vector<1x1x32xf32> to vector<1x32xf32>
    %cst = arith.constant dense<0.000000e+00> : vector<64xf32>
    %8 = vector.multi_reduction <add>, %3, %cst [1] : vector<64x32xf32> to vector<64xf32>
    %9 = vector.shape_cast %8 : vector<64xf32> to vector<64x1xf32>
    %cst_8 = arith.constant 3.200000e+01 : f32
    %10 = vector.broadcast %cst_8 : f32 to vector<64x1xf32>
    %11 = arith.divf %9, %10 : vector<64x1xf32>
    %12 = vector.broadcast %11 : vector<64x1xf32> to vector<64x32xf32>
    %13 = arith.subf %3, %12 : vector<64x32xf32>
    %14 = arith.mulf %13, %13 : vector<64x32xf32>
    %cst_9 = arith.constant dense<0.000000e+00> : vector<64xf32>
    %15 = vector.multi_reduction <add>, %14, %cst_9 [1] : vector<64x32xf32> to vector<64xf32>
    %16 = vector.shape_cast %15 : vector<64xf32> to vector<64x1xf32>
    %cst_10 = arith.constant 3.200000e+01 : f32
    %17 = vector.broadcast %cst_10 : f32 to vector<64x1xf32>
    %18 = arith.divf %16, %17 : vector<64x1xf32>
    %19 = vector.broadcast %11 : vector<64x1xf32> to vector<64x32xf32>
    %20 = arith.subf %3, %19 : vector<64x32xf32>
    %cst_11 = arith.constant 9.99999974E-6 : f32
    %21 = vector.broadcast %cst_11 : f32 to vector<64x1xf32>
    %22 = arith.addf %18, %21 : vector<64x1xf32>
    %23 = math.rsqrt %22 : vector<64x1xf32>
    %24 = vector.broadcast %23 : vector<64x1xf32> to vector<64x32xf32>
    %25 = arith.mulf %20, %24 : vector<64x32xf32>
    %26 = vector.broadcast %5 : vector<1x32xf32> to vector<64x32xf32>
    %27 = arith.mulf %25, %26 : vector<64x32xf32>
    %28 = vector.broadcast %7 : vector<1x32xf32> to vector<64x32xf32>
    %29 = arith.addf %27, %28 : vector<64x32xf32>
    %c0_12 = arith.constant 0 : index
    %c0_13 = arith.constant 0 : index
    %30 = vector.load %arg5[%c0_12, %c0_13] : memref<80x64xf32, #tpu.memory_space<vmem>>, vector<80x64xf32>
    %cst_14 = arith.constant dense<0.000000e+00> : vector<80x32xf32>
    %31 = tpu.matmul %30, %29, %cst_14 {dimension_numbers = #tpu.dot_dimension_numbers<[1], [0], [0], [1], [0, 0, 1, 1], [], []>} : vector<80x64xf32>, vector<64x32xf32>, vector<80x32xf32> -> vector<80x32xf32>
    %32 = vector.extract_strided_slice %31 {offsets = [0, 0], sizes = [40, 32], strides = [1, 1]} : vector<80x32xf32> to vector<40x32xf32>
    %33 = vector.extract_strided_slice %31 {offsets = [40, 0], sizes = [40, 32], strides = [1, 1]} : vector<80x32xf32> to vector<40x32xf32>
    %c0_15 = arith.constant 0 : index
    %c0_16 = arith.constant 0 : index
    %c0_17 = arith.constant 0 : index
    %34 = vector.load %arg7[%c0_15, %c0_16, %c0_17] : memref<1x40x32xf32, #tpu.memory_space<vmem>>, vector<1x40x32xf32>
    %35 = vector.shape_cast %34 : vector<1x40x32xf32> to vector<40x32xf32>
    %c0_18 = arith.constant 0 : index
    %c0_19 = arith.constant 0 : index
    %c0_20 = arith.constant 0 : index
    %36 = vector.load %arg8[%c0_18, %c0_19, %c0_20] : memref<1x40x32xf32, #tpu.memory_space<vmem>>, vector<1x40x32xf32>
    %37 = vector.shape_cast %36 : vector<1x40x32xf32> to vector<40x32xf32>
    %38 = arith.mulf %32, %35 : vector<40x32xf32>
    %39 = arith.mulf %33, %37 : vector<40x32xf32>
    %40 = arith.subf %38, %39 : vector<40x32xf32>
    %41 = arith.mulf %32, %37 : vector<40x32xf32>
    %42 = arith.mulf %33, %35 : vector<40x32xf32>
    %43 = arith.addf %41, %42 : vector<40x32xf32>
    %44 = tpu.concatenate %40, %43 in 0 : vector<40x32xf32>, vector<40x32xf32> -> vector<80x32xf32>
    %c0_21 = arith.constant 0 : index
    %c0_22 = arith.constant 0 : index
    %45 = vector.load %arg6[%c0_21, %c0_22] : memref<64x80xf32, #tpu.memory_space<vmem>>, vector<64x80xf32>
    %cst_23 = arith.constant dense<0.000000e+00> : vector<64x32xf32>
    %46 = tpu.matmul %45, %44, %cst_23 {dimension_numbers = #tpu.dot_dimension_numbers<[1], [0], [0], [1], [0, 0, 1, 1], [], []>} : vector<64x80xf32>, vector<80x32xf32>, vector<64x32xf32> -> vector<64x32xf32>
    %c0_24 = arith.constant 0 : index
    %c0_25 = arith.constant 0 : index
    %c0_26 = arith.constant 0 : index
    %47 = vector.load %arg11[%c0_24, %c0_25, %c0_26] : memref<1x1x32xf32, #tpu.memory_space<vmem>>, vector<1x1x32xf32>
    %48 = vector.shape_cast %47 : vector<1x1x32xf32> to vector<1x32xf32>
    %c0_27 = arith.constant 0 : index
    %c0_28 = arith.constant 0 : index
    %c0_29 = arith.constant 0 : index
    %49 = vector.load %arg12[%c0_27, %c0_28, %c0_29] : memref<1x1x32xf32, #tpu.memory_space<vmem>>, vector<1x1x32xf32>
    %50 = vector.shape_cast %49 : vector<1x1x32xf32> to vector<1x32xf32>
    %cst_30 = arith.constant dense<0.000000e+00> : vector<64xf32>
    %51 = vector.multi_reduction <add>, %46, %cst_30 [1] : vector<64x32xf32> to vector<64xf32>
    %52 = vector.shape_cast %51 : vector<64xf32> to vector<64x1xf32>
    %cst_31 = arith.constant 3.200000e+01 : f32
    %53 = vector.broadcast %cst_31 : f32 to vector<64x1xf32>
    %54 = arith.divf %52, %53 : vector<64x1xf32>
    %55 = vector.broadcast %54 : vector<64x1xf32> to vector<64x32xf32>
    %56 = arith.subf %46, %55 : vector<64x32xf32>
    %57 = arith.mulf %56, %56 : vector<64x32xf32>
    %cst_32 = arith.constant dense<0.000000e+00> : vector<64xf32>
    %58 = vector.multi_reduction <add>, %57, %cst_32 [1] : vector<64x32xf32> to vector<64xf32>
    %59 = vector.shape_cast %58 : vector<64xf32> to vector<64x1xf32>
    %cst_33 = arith.constant 3.200000e+01 : f32
    %60 = vector.broadcast %cst_33 : f32 to vector<64x1xf32>
    %61 = arith.divf %59, %60 : vector<64x1xf32>
    %62 = vector.broadcast %54 : vector<64x1xf32> to vector<64x32xf32>
    %63 = arith.subf %46, %62 : vector<64x32xf32>
    %cst_34 = arith.constant 9.99999974E-6 : f32
    %64 = vector.broadcast %cst_34 : f32 to vector<64x1xf32>
    %65 = arith.addf %61, %64 : vector<64x1xf32>
    %66 = math.rsqrt %65 : vector<64x1xf32>
    %67 = vector.broadcast %66 : vector<64x1xf32> to vector<64x32xf32>
    %68 = arith.mulf %63, %67 : vector<64x32xf32>
    %69 = vector.broadcast %48 : vector<1x32xf32> to vector<64x32xf32>
    %70 = arith.mulf %68, %69 : vector<64x32xf32>
    %71 = vector.broadcast %50 : vector<1x32xf32> to vector<64x32xf32>
    %72 = arith.addf %70, %71 : vector<64x32xf32>
    %c0_35 = arith.constant 0 : index
    %c0_36 = arith.constant 0 : index
    %c0_37 = arith.constant 0 : index
    %73 = vector.load %arg13[%c0_35, %c0_36, %c0_37] : memref<1x32x128xf32, #tpu.memory_space<vmem>>, vector<1x32x128xf32>
    %74 = vector.shape_cast %73 : vector<1x32x128xf32> to vector<32x128xf32>
    %cst_38 = arith.constant dense<0.000000e+00> : vector<64x128xf32>
    %75 = tpu.matmul %72, %74, %cst_38 {dimension_numbers = #tpu.dot_dimension_numbers<[1], [0], [0], [1], [0, 0, 1, 1], [], []>} : vector<64x32xf32>, vector<32x128xf32>, vector<64x128xf32> -> vector<64x128xf32>
    %c0_39 = arith.constant 0 : index
    %c0_40 = arith.constant 0 : index
    %c0_41 = arith.constant 0 : index
    %76 = vector.load %arg14[%c0_39, %c0_40, %c0_41] : memref<1x1x128xf32, #tpu.memory_space<vmem>>, vector<1x1x128xf32>
    %77 = vector.shape_cast %76 : vector<1x1x128xf32> to vector<1x128xf32>
    %78 = vector.broadcast %77 : vector<1x128xf32> to vector<64x128xf32>
    %79 = arith.addf %75, %78 : vector<64x128xf32>
    %cst_42 = arith.constant 5.000000e-01 : f32
    %80 = vector.broadcast %cst_42 : f32 to vector<64x128xf32>
    %81 = arith.mulf %80, %79 : vector<64x128xf32>
    %cst_43 = arith.constant 0.707106769 : f32
    %82 = vector.broadcast %cst_43 : f32 to vector<64x128xf32>
    %83 = arith.mulf %79, %82 : vector<64x128xf32>
    %cst_44 = arith.constant 0.000000e+00 : f32
    %84 = vector.broadcast %cst_44 : f32 to vector<64x128xf32>
    %85 = arith.cmpf oge, %83, %84 : vector<64x128xf32>
    %cst_45 = arith.constant 1.000000e+00 : f32
    %cst_46 = arith.constant -1.000000e+00 : f32
    %86 = vector.broadcast %cst_45 : f32 to vector<64x128xf32>
    %87 = vector.broadcast %cst_46 : f32 to vector<64x128xf32>
    %88 = arith.select %85, %86, %87 : vector<64x128xi1>, vector<64x128xf32>
    %89 = math.absf %83 : vector<64x128xf32>
    %cst_47 = arith.constant 0.327591091 : f32
    %90 = vector.broadcast %cst_47 : f32 to vector<64x128xf32>
    %91 = arith.mulf %90, %89 : vector<64x128xf32>
    %cst_48 = arith.constant 1.000000e+00 : f32
    %92 = vector.broadcast %cst_48 : f32 to vector<64x128xf32>
    %93 = arith.addf %92, %91 : vector<64x128xf32>
    %cst_49 = arith.constant 1.000000e+00 : f32
    %94 = vector.broadcast %cst_49 : f32 to vector<64x128xf32>
    %95 = arith.divf %94, %93 : vector<64x128xf32>
    %cst_50 = arith.constant 1.06140542 : f32
    %96 = vector.broadcast %cst_50 : f32 to vector<64x128xf32>
    %97 = arith.mulf %96, %95 : vector<64x128xf32>
    %cst_51 = arith.constant -1.45315206 : f32
    %98 = vector.broadcast %cst_51 : f32 to vector<64x128xf32>
    %99 = arith.addf %97, %98 : vector<64x128xf32>
    %100 = arith.mulf %99, %95 : vector<64x128xf32>
    %cst_52 = arith.constant 1.42141378 : f32
    %101 = vector.broadcast %cst_52 : f32 to vector<64x128xf32>
    %102 = arith.addf %100, %101 : vector<64x128xf32>
    %103 = arith.mulf %102, %95 : vector<64x128xf32>
    %cst_53 = arith.constant -0.284496725 : f32
    %104 = vector.broadcast %cst_53 : f32 to vector<64x128xf32>
    %105 = arith.addf %103, %104 : vector<64x128xf32>
    %106 = arith.mulf %105, %95 : vector<64x128xf32>
    %cst_54 = arith.constant 0.254829586 : f32
    %107 = vector.broadcast %cst_54 : f32 to vector<64x128xf32>
    %108 = arith.addf %106, %107 : vector<64x128xf32>
    %109 = arith.mulf %108, %95 : vector<64x128xf32>
    %cst_55 = arith.constant 0.000000e+00 : f32
    %110 = vector.broadcast %cst_55 : f32 to vector<64x128xf32>
    %111 = arith.subf %110, %89 : vector<64x128xf32>
    %112 = arith.mulf %111, %89 : vector<64x128xf32>
    %113 = math.exp %112 : vector<64x128xf32>
    %114 = arith.mulf %109, %113 : vector<64x128xf32>
    %cst_56 = arith.constant 1.000000e+00 : f32
    %115 = vector.broadcast %cst_56 : f32 to vector<64x128xf32>
    %116 = arith.subf %115, %114 : vector<64x128xf32>
    %117 = arith.mulf %88, %116 : vector<64x128xf32>
    %cst_57 = arith.constant 1.000000e+00 : f32
    %118 = vector.broadcast %cst_57 : f32 to vector<64x128xf32>
    %119 = arith.addf %118, %117 : vector<64x128xf32>
    %120 = arith.mulf %81, %119 : vector<64x128xf32>
    %c0_58 = arith.constant 0 : index
    %c0_59 = arith.constant 0 : index
    %c0_60 = arith.constant 0 : index
    %121 = vector.load %arg15[%c0_58, %c0_59, %c0_60] : memref<1x128x32xf32, #tpu.memory_space<vmem>>, vector<1x128x32xf32>
    %122 = vector.shape_cast %121 : vector<1x128x32xf32> to vector<128x32xf32>
    %cst_61 = arith.constant dense<0.000000e+00> : vector<64x32xf32>
    %123 = tpu.matmul %120, %122, %cst_61 {dimension_numbers = #tpu.dot_dimension_numbers<[1], [0], [0], [1], [0, 0, 1, 1], [], []>} : vector<64x128xf32>, vector<128x32xf32>, vector<64x32xf32> -> vector<64x32xf32>
    %c0_62 = arith.constant 0 : index
    %c0_63 = arith.constant 0 : index
    %c0_64 = arith.constant 0 : index
    %124 = vector.load %arg16[%c0_62, %c0_63, %c0_64] : memref<1x1x32xf32, #tpu.memory_space<vmem>>, vector<1x1x32xf32>
    %125 = vector.shape_cast %124 : vector<1x1x32xf32> to vector<1x32xf32>
    %126 = vector.broadcast %125 : vector<1x32xf32> to vector<64x32xf32>
    %127 = arith.addf %123, %126 : vector<64x32xf32>
    %128 = arith.addf %3, %127 : vector<64x32xf32>
    %c0_65 = arith.constant 0 : index
    %c0_66 = arith.constant 0 : index
    %129 = vector.load %arg20[%c0_65, %c0_66] : memref<64x32xf32, #tpu.memory_space<vmem>>, vector<64x32xf32>
    tpu.vector_store %arg20[%c0_65, %c0_66], %128 {strides = array<i32>} : memref<64x32xf32, #tpu.memory_space<vmem>>, vector<64x32xf32>,
    %c1_i32 = arith.constant 1 : i32
    %130 = arith.cmpi eq, %arg1, %c1_i32 : i32
    %131 = arith.extui %130 : i1 to i32
    %c0_i32_67 = arith.constant 0 : i32
    %132 = arith.cmpi ne, %131, %c0_i32_67 : i32
    scf.if %132 {
      %cst_68 = arith.constant dense<0.000000e+00> : vector<32xf32>
      %133 = vector.multi_reduction <add>, %128, %cst_68 [0] : vector<64x32xf32> to vector<32xf32>
      %134 = vector.shape_cast %133 : vector<32xf32> to vector<1x32xf32>
      %cst_69 = arith.constant 6.400000e+01 : f32
      %135 = vector.broadcast %cst_69 : f32 to vector<1x32xf32>
      %136 = arith.divf %134, %135 : vector<1x32xf32>
      %c0_70 = arith.constant 0 : index
      %c0_71 = arith.constant 0 : index
      %137 = vector.load %arg17[%c0_70, %c0_71] : memref<32x16xf32, #tpu.memory_space<vmem>>, vector<32x16xf32>
      %cst_72 = arith.constant dense<0.000000e+00> : vector<1x16xf32>
      %138 = tpu.matmul %136, %137, %cst_72 {dimension_numbers = #tpu.dot_dimension_numbers<[1], [0], [0], [1], [0, 0, 1, 1], [], []>} : vector<1x32xf32>, vector<32x16xf32>, vector<1x16xf32> -> vector<1x16xf32>
      %c0_73 = arith.constant 0 : index
      %c0_74 = arith.constant 0 : index
      %139 = vector.load %arg18[%c0_73, %c0_74] : memref<1x16xf32, #tpu.memory_space<vmem>>, vector<1x16xf32>
      %140 = arith.addf %138, %139 : vector<1x16xf32>
      %c0_75 = arith.constant 0 : index
      %c0_76 = arith.constant 0 : index
      %c0_77 = arith.constant 0 : index
      %141 = vector.load %arg19[%c0_75, %c0_76, %c0_77] : memref<1x1x16xf32, #tpu.memory_space<vmem>>, vector<1x1x16xf32>
      %142 = vector.shape_cast %141 : vector<1x1x16xf32> to vector<1x16xf32>
      %143 = vector.shape_cast %140 : vector<1x16xf32> to vector<1x1x16xf32>
      tpu.vector_store %arg19[%c0_75, %c0_76, %c0_77], %143 {strides = array<i32>} : memref<1x1x16xf32, #tpu.memory_space<vmem>>, vector<1x1x16xf32>,
    } else {
    }
    return
  }
  func.func @transform_0(%arg0: i32, %arg1: i32) -> (i32, i32, i32) {
    %c0_i32 = arith.constant 0 : i32
    %c0_i32_0 = arith.constant 0 : i32
    %c0_i32_1 = arith.constant 0 : i32
    return %arg0, %c0_i32, %c0_i32_0 : i32, i32, i32
  }
  func.func @transform_1(%arg0: i32, %arg1: i32) -> (i32, i32) {
    %c0_i32 = arith.constant 0 : i32
    %c0_i32_0 = arith.constant 0 : i32
    %c0_i32_1 = arith.constant 0 : i32
    return %c0_i32, %c0_i32_0 : i32, i32
  }
  func.func @transform_2(%arg0: i32, %arg1: i32) -> (i32, i32) {
    %c0_i32 = arith.constant 0 : i32
    %c0_i32_0 = arith.constant 0 : i32
    %c0_i32_1 = arith.constant 0 : i32
    return %c0_i32, %c0_i32_0 : i32, i32
  }
  func.func @transform_3(%arg0: i32, %arg1: i32) -> (i32, i32) {
    %c0_i32 = arith.constant 0 : i32
    %c0_i32_0 = arith.constant 0 : i32
    %c0_i32_1 = arith.constant 0 : i32
    return %c0_i32, %c0_i32_0 : i32, i32
  }
  func.func @transform_4(%arg0: i32, %arg1: i32) -> (i32, i32) {
    %c0_i32 = arith.constant 0 : i32
    %c0_i32_0 = arith.constant 0 : i32
    %c0_i32_1 = arith.constant 0 : i32
    return %c0_i32, %c0_i32_0 : i32, i32
  }
  func.func @transform_5(%arg0: i32, %arg1: i32) -> (i32, i32, i32) {
    %c0_i32 = arith.constant 0 : i32
    %c0_i32_0 = arith.constant 0 : i32
    %c0_i32_1 = arith.constant 0 : i32
    return %arg1, %c0_i32, %c0_i32_0 : i32, i32, i32
  }
  func.func @transform_6(%arg0: i32, %arg1: i32) -> (i32, i32, i32) {
    %c0_i32 = arith.constant 0 : i32
    %c0_i32_0 = arith.constant 0 : i32
    %c0_i32_1 = arith.constant 0 : i32
    return %arg1, %c0_i32, %c0_i32_0 : i32, i32, i32
  }
  func.func @transform_7(%arg0: i32, %arg1: i32) -> (i32, i32, i32) {
    %c0_i32 = arith.constant 0 : i32
    %c0_i32_0 = arith.constant 0 : i32
    %c0_i32_1 = arith.constant 0 : i32
    return %arg1, %c0_i32, %c0_i32_0 : i32, i32, i32
  }
  func.func @transform_8(%arg0: i32, %arg1: i32) -> (i32, i32, i32) {
    %c0_i32 = arith.constant 0 : i32
    %c0_i32_0 = arith.constant 0 : i32
    %c0_i32_1 = arith.constant 0 : i32
    return %arg1, %c0_i32, %c0_i32_0 : i32, i32, i32
  }
  func.func @transform_9(%arg0: i32, %arg1: i32) -> (i32, i32, i32) {
    %c0_i32 = arith.constant 0 : i32
    %c0_i32_0 = arith.constant 0 : i32
    %c0_i32_1 = arith.constant 0 : i32
    return %arg1, %c0_i32, %c0_i32_0 : i32, i32, i32
  }
  func.func @transform_10(%arg0: i32, %arg1: i32) -> (i32, i32, i32) {
    %c0_i32 = arith.constant 0 : i32
    %c0_i32_0 = arith.constant 0 : i32
    %c0_i32_1 = arith.constant 0 : i32
    return %arg1, %c0_i32, %c0_i32_0 : i32, i32, i32
  }
  func.func @transform_11(%arg0: i32, %arg1: i32) -> (i32, i32, i32) {
    %c0_i32 = arith.constant 0 : i32
    %c0_i32_0 = arith.constant 0 : i32
    %c0_i32_1 = arith.constant 0 : i32
    return %arg1, %c0_i32, %c0_i32_0 : i32, i32, i32
  }
  func.func @transform_12(%arg0: i32, %arg1: i32) -> (i32, i32, i32) {
    %c0_i32 = arith.constant 0 : i32
    %c0_i32_0 = arith.constant 0 : i32
    %c0_i32_1 = arith.constant 0 : i32
    return %arg1, %c0_i32, %c0_i32_0 : i32, i32, i32
  }
  func.func @transform_13(%arg0: i32, %arg1: i32) -> (i32, i32, i32) {
    %c0_i32 = arith.constant 0 : i32
    %c0_i32_0 = arith.constant 0 : i32
    %c0_i32_1 = arith.constant 0 : i32
    return %arg1, %c0_i32, %c0_i32_0 : i32, i32, i32
  }
  func.func @transform_14(%arg0: i32, %arg1: i32) -> (i32, i32, i32) {
    %c0_i32 = arith.constant 0 : i32
    %c0_i32_0 = arith.constant 0 : i32
    %c0_i32_1 = arith.constant 0 : i32
    return %arg1, %c0_i32, %c0_i32_0 : i32, i32, i32
  }
  func.func @transform_15(%arg0: i32, %arg1: i32) -> (i32, i32) {
    %c0_i32 = arith.constant 0 : i32
    %c0_i32_0 = arith.constant 0 : i32
    %c0_i32_1 = arith.constant 0 : i32
    return %c0_i32, %c0_i32_0 : i32, i32
  }
  func.func @transform_16(%arg0: i32, %arg1: i32) -> (i32, i32) {
    %c0_i32 = arith.constant 0 : i32
    %c0_i32_0 = arith.constant 0 : i32
    %c0_i32_1 = arith.constant 0 : i32
    return %c0_i32, %c0_i32_0 : i32, i32
  }
  func.func @transform_17(%arg0: i32, %arg1: i32) -> (i32, i32, i32) {
    %c0_i32 = arith.constant 0 : i32
    %c0_i32_0 = arith.constant 0 : i32
    %c0_i32_1 = arith.constant 0 : i32
    return %arg0, %c0_i32, %c0_i32_0 : i32, i32, i32
  }
}

</mosaic_0001>

<bundles_post_ra>
// kernel: tpu_custom_call.1
= control target key start
LH: loop header
LB: loop body
LE: loop exit
PB: predicated region body
PF: predicated region fallthrough
CT: control target
= control target key end

     0   :  { %s3697_s0 = inlined_call_operand.vmem [shape: f32[2,64,48], index: 0, kind: input, shape index: {}]   ;;  %s3698_s1 = inlined_call_operand.vmem [shape: f32[48,32], index: 1, kind: input, shape index: {}]   ;;  %s3699_s2 = inlined_call_operand.vmem [shape: f32[1,32], index: 2, kind: input, shape index: {}]   ;;  %s3700_s3 = inlined_call_operand.vmem [shape: f32[80,64], index: 3, kind: input, shape index: {}]   ;;  %s3701_s4 = inlined_call_operand.vmem [shape: f32[64,80], index: 4, kind: input, shape index: {}]   ;;  %s3702_s5 = inlined_call_operand.vmem [shape: f32[2,40,32], index: 5, kind: input, shape index: {}]   ;;  %s3703_s6 = inlined_call_operand.vmem [shape: f32[2,40,32], index: 6, kind: input, shape index: {}]   ;;  %s3704_s7 = inlined_call_operand.vmem [shape: f32[2,1,32], index: 7, kind: input, shape index: {}]   ;;  %s3705_s8 = inlined_call_operand.vmem [shape: f32[2,1,32], index: 8, kind: input, shape index: {}]   ;;  %s3706_s9 = inlined_call_operand.vmem [shape: f32[2,1,32], index: 9, kind: input, shape index: {}]   ;;  %s3707_s10 = inlined_call_operand.vmem [shape: f32[2,1,32], index: 10, kind: input, shape index: {}]   ;;  %s3708_s11 = inlined_call_operand.vmem [shape: f32[2,32,128], index: 11, kind: input, shape index: {}]   ;;  %s3709_s12 = inlined_call_operand.vmem [shape: f32[2,1,128], index: 12, kind: input, shape index: {}]   ;;  %s3710_s13 = inlined_call_operand.vmem [shape: f32[2,128,32], index: 13, kind: input, shape index: {}]   ;;  %s3711_s14 = inlined_call_operand.vmem [shape: f32[2,1,32], index: 14, kind: input, shape index: {}]   ;;  %s3712_s15 = inlined_call_operand.vmem [shape: f32[32,16], index: 15, kind: input, shape index: {}]   ;;  %s3713_s16 = inlined_call_operand.vmem [shape: f32[1,16], index: 16, kind: input, shape index: {}]   ;;  %s3714_s17 = inlined_call_operand.hbm [shape: f32[2,1,16], index: 17, kind: output, shape index: {}]  }
   0x1   :  { %3732 = sst [smem:[#allocation18_spill]] %s3697_s0 }
   0x2   :  { %3733 = sst [smem:[#allocation19_spill]] %s3698_s1 }
   0x3   :  { %3734 = sst [smem:[#allocation20_spill]] %s3700_s3 }
   0x4   :  { %3735 = sst [smem:[#allocation21_spill]] %s3701_s4 }
   0x5   :  { %3736 = sst [smem:[#allocation22_spill]] %s3702_s5 }
   0x6   :  { %3737 = sst [smem:[#allocation23_spill]] %s3712_s15 }
   0x7   :  { %3738 = sst [smem:[#allocation24_spill]] %s3713_s16 }
   0x8   :  { %3739 = sst [smem:[#allocation25_spill]] %s3714_s17 }
   0x9   :  { %22 = vsyncpa [#allocation4], 0 }
   0xa   :  { %24 = vsyncpa [#allocation4 + $0x1], 0  ;;  %s3041_s24 = smov 0   ;;  %s3043_s25 = smov 0  }
   0xb   :  { %s3045_s26 = smov 0   ;;  %s3047_s27 = smov 0  }
   0xc   :  { %s3049_s28 = smov 0   ;;  %s3051_s29 = smov 0  }
   0xd   :  { %s3053_s0 = smov 0   ;;  %s3055_s30 = smov 0  }
   0xe LB: > { %3740 = sst [smem:[#allocation6_spill]] %s2916_s24  ;;  %s2286_s18 = sadd.s32 4294967295, %s2944_s30   ;;  %s2944_s30 = sphi %s3055_s30, %s30_s30   ;;  %s2940_s0 = sphi %s3053_s0, %s3780_s0   ;;  %s2936_s29 = sphi %s3051_s29, %s3779_s29   ;;  %s2932_s28 = sphi %s3049_s28, %s3778_s28   ;;  %s2928_s27 = sphi %s3047_s27, %s3777_s27   ;;  %s2924_s26 = sphi %s3045_s26, %s3776_s26   ;;  %s2920_s25 = sphi %s3043_s25, %s3782_s25   ;;  %s2916_s24 = sphi %s3041_s24, %s3781_s24  }
   0xf   : > { %3741 = sst [smem:[#allocation7_spill]] %s2924_s26  ;;  %s2287_s19 = sadd.s32 4294967294, %s2944_s30  }
  0x10   : > { %3742 = sst [smem:[#allocation8_spill]] %s2932_s28  ;;  %s39_s1 = sadd.s32 1, %s2936_s29 }
  0x11   : > { %3743 = sst [smem:[#allocation9_spill]] %s2936_s29  ;;  %p40_p0 = scmp.ge.s32.totalorder %s39_s1, 2 }
  0x12   : > { %3744 = sst [smem:[#allocation10_spill]] %s2940_s0  ;;  %s42_s20 = sadd.s32 1, %s2940_s0 }
  0x13   : > { %3745 = sst [smem:[#allocation11_spill]] %s2944_s30  ;;  %p471_p1 = scmp.ne.s32.totalorder %s2924_s26, %s2920_s25 }
  0x14   : > { %p472_p2 = scmp.eq.s32.totalorder %s2286_s18, 3  ;;  %s3784_s1 = smov (%p40_p0, %s39_s1), 0 }
  0x15   : > { %3746 = sst [smem:[#allocation12_spill]] %s3784_s1  ;;  %s3786_s20 = smov (!%p40_p0, %s42_s20), %s2940_s0 }
  0x16   : > { %p3090_p3 = por %p472_p2, %p471_p1  ;;  %p477_p4 = scmp.ne.s32.totalorder %s2920_s25, %s2916_s24 }
  0x17   : > { %p44_p5 = scmp.ge.s32.totalorder %s3786_s20, 2  ;;  %p478_p6 = scmp.eq.s32.totalorder %s2287_s19, 3 }
  0x18   : > { %s3747_s21 = scalar_select %p3090_p3, 1, 0 }
  0x19   : > { %p2290_p7 = scmp.ge.s32.totalorder %s2944_s30, 1  ;;  %p590_p8 = scmp.lt.s32.totalorder %s2944_s30, 5 }
  0x1a   : > { %3748 = sst [smem:[#allocation13_spill]] %s3747_s21  ;;  %s3788_s20 = smov (%p44_p5, %s3786_s20), 0 }
  0x1b   : > { %3749 = sst [smem:[#allocation14_spill]] %s3788_s20  ;;  %p3100_p9 = por %p478_p6, %p477_p4 }
  0x1c   : > { %p591_p10 = pnand %p2290_p7, %p590_p8  ;;  %s458_s23 = ssub.s32 %s2940_s0, %s3788_s20 }
  0x1d   : > { %s3750_s22 = scalar_select %p3100_p9, 1, 0 }
  0x1e   : > { %s461_s18 = sadd.s32 1, %s2924_s26  ;;  %p459_p11 = scmp.eq.s32.totalorder %s458_s23, 0 }
  0x1f   : > { %3751 = sst [smem:[#allocation15_spill]] %s3750_s22  ;;  %594 = sbr.rel (%p591_p10) target bundleno = 2165 (0x875), region = 88 }
  0x20   : > { %s3108_s1 = scalar_select %p459_p11, %s2924_s26, %s461_s18  }
  0x22   : > { %3752 = sst [smem:[#allocation16_spill]] %s3108_s1 }
  0x26   : > { %p679_p12 = scmp.lt.s32.totalorder %s2932_s28, 1  ;;  %p684_p13 = scmp.lt.s32.totalorder %s2928_s27, 1 }
  0x27   : > { %s3753_s0 = sld [smem:[#allocation18_spill]]  ;;  %s3754_s5 = sld [smem:[#allocation22_spill]] }
  0x28   : > { %s680_s29 = scalar_select %p679_p12, %s2932_s28, 1 }
  0x29   : > { %s3115_s24 = scalar_select %p684_p13, %s2928_s27, 1 }
  0x2a   : > { %s2346_s23 = sshll.u32 %s680_s29, 6  ;;  %s3756_s22 = sand.u32 1, %s2920_s25  }
  0x2b   : > { %s2702_s1 = smul.u32 40, %s3115_s24  ;;  %s2347_s17 = sshll.u32 %s3115_s24, 5 }
  0x2c   : > { %s713_s15 = scalar_lea.vmem %s3709_s12, %s3115_s24  ;;  %s2348_s3 = sshll.u32 %s3115_s24, 7 }
  0x2d   : > { %s3120_s19 = scalar_lea.vmem %s3753_s0, %s2346_s23  ;;  %s3134_s4 = scalar_lea.vmem %s3754_s5, %s2702_s1 }
  0x2e   : > { %3755 = sst [smem:[#allocation17_spill]] %s3134_s4  ;;  %s3139_s20 = scalar_lea.vmem %s3703_s6, %s2702_s1 }
  0x2f   : > { %s3157_s4 = scalar_lea.vmem %s3708_s11, %s2347_s17  ;;  %s3163_s0 = scalar_lea.vmem %s3710_s13, %s2348_s3 }
  0x30   : > { %s721_s26 = scalar_lea.vmem %s3711_s14, %s3115_s24  ;;  %s3171_s30 = scalar_lea.vmem [#allocation3], %s3756_s22 }
  0x31   : > { %p2299_p0 = scmp.ne.s32.totalorder %s2928_s27, 0 }
  0x32   : > { %s3757_s17 = sld [smem:[#allocation19_spill]] (!%p2299_p0)  ;;  %v726_v8 = vld [vmem:[%s3120_s19] sm:$0xff] (!%p2299_p0)  ;;  %vm747_vm0 = vcmask (!%p2299_p0), 392192   ;;  %v727_v11 = vld [vmem:[%s3120_s19 + $0x8] sm:$0xff] (!%p2299_p0)  ;;  %v728_v13 = vld [vmem:[%s3120_s19 + $0x10] sm:$0xff] (!%p2299_p0)  ;;  %vm877_vm1 = vcmask (!%p2299_p0), 261120  }
  0x33   : > { %725 = sbr.rel (%p2299_p0) target bundleno = 291 (0x123), region = 92  ;;  %v730_v9 = vld [vmem:[%s3120_s19 + $0x20] sm:$0xff] (!%p2299_p0)  ;;  %2452 = vmatprep.mubr.msk.f32.mxu0 (!%p2299_p0), %vm747_vm0, %v726_v8  ;;  %v731_v12 = vld [vmem:[%s3120_s19 + $0x28] sm:$0xff] (!%p2299_p0)  ;;  %v732_v14 = vld [vmem:[%s3120_s19 + $0x30] sm:$0xff] (!%p2299_p0) }
  0x34   : > { %2458 = vmatprep.mubr.msk.f32.mxu1 (!%p2299_p0), %vm747_vm0, %v730_v9  ;;  %v729_v15 = vld [vmem:[%s3120_s19 + $0x18] sm:$0xff] (!%p2299_p0)  ;;  %v2300_v17 = vld [vmem:[%s3699_s2] ss:$0 sm:$0xff] (!%p2299_p0) }
  0x35   : > { %v733_v16 = vld [vmem:[%s3120_s19 + $0x38] sm:$0xff] (!%p2299_p0) }
  0x38   : > { %v734_v0 = vld [vmem:[%s3757_s17] sm:$0xff] (!%p2299_p0)  ;;  %v735_v1 = vld [vmem:[%s3757_s17 + $0x8] sm:$0xff] (!%p2299_p0)  ;;  %v736_v2 = vld [vmem:[%s3757_s17 + $0x10] sm:$0xff] (!%p2299_p0) }
  0x39   : > { %v2602_v3 = vpack.c.bf16 (!%p2299_p0), %v735_v1, %v734_v0  ;;  %v737_v4 = vld [vmem:[%s3757_s17 + $0x18] sm:$0xff] (!%p2299_p0)  ;;  %v738_v6 = vld [vmem:[%s3757_s17 + $0x20] sm:$0xff] (!%p2299_p0)  ;;  %v739_v7 = vld [vmem:[%s3757_s17 + $0x28] sm:$0xff] (!%p2299_p0) }
  0x3a   : > { %v2606_v5 = vpack.c.bf16 %v737_v4, %v736_v2  ;;  %v2610_v10 = vpack.c.bf16 %v739_v7, %v738_v6 }
  0x3b   : > { %2603 = vmatprep.subr.bf16.mxu0 %v2602_v3  ;;  %2696 = vmatprep.subr.bf16.mxu1 %v2602_v3 }
  0x3c   : > { %2605 = vmatpush3.bf16.msra.mxu0 %v2602_v3  ;;  %2699 = vmatpush3.bf16.msra.mxu1 %v2602_v3 }
  0x3d   : > { %2607 = vmatprep.subr.bf16.mxu0 %v2606_v5  ;;  %2697 = vmatprep.subr.bf16.mxu1 %v2606_v5 }
  0x40   : > { %2609 = vmatpush3.bf16.msra.mxu0 %v2606_v5  ;;  %2700 = vmatpush3.bf16.msra.mxu1 %v2606_v5 }
  0x41   : > { %2611 = vmatprep.subr.bf16.mxu0 %v2610_v10  ;;  %2698 = vmatprep.subr.bf16.mxu1 %v2610_v10 }
  0x44   : > { %2613 = vmatpush3.bf16.msra.mxu0 %v2610_v10  ;;  %2701 = vmatpush3.bf16.msra.mxu1 %v2610_v10 }
  0x47   : > { %2453 = vmatmul.mubr.msk.f32.vlgmr.msra.gmra.mrb[0].mxu0 %vm747_vm0, %v727_v11  ;;  %2459 = vmatmul.mubr.msk.f32.vlgmr.msra.gmra.mrb[0].mxu1 %vm747_vm0, %v731_v12 }
  0x48   : > { %2455 = vmatprep.mubr.msk.f32.mxu0 %vm747_vm0, %v728_v13  ;;  %2461 = vmatprep.mubr.msk.f32.mxu1 %vm747_vm0, %v732_v14 }
  0x4b   : > { %2456 = vmatmul.mubr.msk.f32.gmra.mrb[2].mxu0 %vm747_vm0, %v729_v15  ;;  %2462 = vmatmul.mubr.msk.f32.gmra.mrb[2].mxu1 %vm747_vm0, %v733_v16 }
 0x11a   : > { %v2454_v18 = vpop.f32.mrb[0].mxu0  ;;  %v2460_v19 = vpop.f32.mrb[0].mxu1 }
 0x11b   : > { %v844_v20 = vadd.f32 %v2454_v18, %v2300_v17  ;;  %v864_v21 = vadd.f32 %v2460_v19, %v2300_v17  ;;  %v838_v22 = vpop.f32.mrb[1].mxu0  ;;  %v858_v23 = vpop.f32.mrb[1].mxu1 }
 0x11c   : > { %v839_v24 = vadd.f32 %v2300_v17, %v838_v22  ;;  %v859_v25 = vadd.f32 %v2300_v17, %v858_v23 }
 0x11d   : > { %879 = vst.msk [vmem:[#allocation2 + $0x8] sm:$0xff] %vm877_vm1, %v844_v20  ;;  %883 = vst.msk [vmem:[#allocation2 + $0x28] sm:$0xff] %vm877_vm1, %v864_v21 }
 0x11e   : > { %878 = vst.msk [vmem:[#allocation2] sm:$0xff] %vm877_vm1, %v839_v24  ;;  %882 = vst.msk [vmem:[#allocation2 + $0x20] sm:$0xff] %vm877_vm1, %v859_v25  ;;  %v2457_v26 = vpop.f32.mrb[2].mxu0  ;;  %v2463_v27 = vpop.f32.mrb[2].mxu1 }
 0x11f   : > { %v854_v28 = vadd.f32 %v2457_v26, %v2300_v17  ;;  %v874_v29 = vadd.f32 %v2463_v27, %v2300_v17  ;;  %v848_v30 = vpop.f32.mrb[3].mxu0  ;;  %v868_v31 = vpop.f32.mrb[3].mxu1 }
 0x120   : > { %v849_v32 = vadd.f32 %v2300_v17, %v848_v30  ;;  %v869_v33 = vadd.f32 %v2300_v17, %v868_v31 }
 0x121   : > { %881 = vst.msk [vmem:[#allocation2 + $0x18] sm:$0xff] %vm877_vm1, %v854_v28  ;;  %885 = vst.msk [vmem:[#allocation2 + $0x38] sm:$0xff] %vm877_vm1, %v874_v29 }
 0x122   : > { %880 = vst.msk [vmem:[#allocation2 + $0x10] sm:$0xff] %vm877_vm1, %v849_v32  ;;  %884 = vst.msk [vmem:[#allocation2 + $0x30] sm:$0xff] %vm877_vm1, %v869_v33 }
 0x123 PF: > { %vm896_vm2 = vcmask 261120   ;;  %s3758_s1 = sld [smem:[#allocation20_spill]]  ;;  %vm1040_vm3 = vcmask 523264   ;;  %s3759_s23 = scalar_lea.vmem %s3704_s7, %s3115_s24  ;;  %vm1234_vm4 = vcmask 654336  }
 0x124   : > { %v887_v36 = vld [vmem:[#allocation2 + $0x8] sm:$0xff]  ;;  %s3760_s5 = scalar_lea.vmem %s3705_s8, %s3115_s24  ;;  %s3761_s19 = sld [smem:[#allocation17_spill]] }
 0x125   : > { %v886_v34 = vld [vmem:[#allocation2] sm:$0xff]  ;;  %v900_v40 = vsel %vm896_vm2, %v887_v36, 0.0  ;;  %v891_v43 = vld [vmem:[#allocation2 + $0x28] sm:$0xff]  ;;  %s3762_s16 = sld [smem:[#allocation21_spill]]  ;;  %p2341_p1 = scmp.ne.s32.totalorder %s2928_s27, 1 }
 0x126   : > { %v897_v37 = vsel %vm896_vm2, %v886_v34, 0.0  ;;  %v890_v42 = vld [vmem:[#allocation2 + $0x20] sm:$0xff]  ;;  %v912_v45 = vsel %vm896_vm2, %v891_v43, 0.0  ;;  %vm2948_vm13 = vmmov (!%p2341_p1), 0   ;;  %vm2103_vm14 = vcmask (!%p2341_p1), 122880  }
 0x127   : > { %898 = vadd.xlane.f32.xlu0 %v897_v37  ;;  %v909_v44 = vsel %vm896_vm2, %v890_v42, 0.0 }
 0x128   : > { %v889_v39 = vld [vmem:[#allocation2 + $0x18] sm:$0xff] }
 0x129   : > { %v888_v35 = vld [vmem:[#allocation2 + $0x10] sm:$0xff]  ;;  %v906_v41 = vsel %vm896_vm2, %v889_v39, 0.0  ;;  %v893_v47 = vld [vmem:[#allocation2 + $0x38] sm:$0xff]  ;;  %v1030_v26 = vld [vmem:[%s3758_s1] sm:$0xff] }
 0x12a   : > { %v903_v38 = vsel %vm896_vm2, %v888_v35, 0.0  ;;  %v892_v46 = vld [vmem:[#allocation2 + $0x30] sm:$0xff]  ;;  %v918_v49 = vsel %vm896_vm2, %v893_v47, 0.0  ;;  %2480 = vmatprep.mubr.msk.f32.mxu0 %vm1040_vm3, %v1030_v26 }
 0x12b   : > { %904 = vadd.xlane.f32.xlu1 %v903_v38  ;;  %901 = vadd.xlane.f32.xlu0 %v900_v40  ;;  %v915_v48 = vsel %vm896_vm2, %v892_v46, 0.0 }
 0x12f   : > { %907 = vadd.xlane.f32.xlu1 %v906_v41  ;;  %910 = vadd.xlane.f32.xlu0 %v909_v44 }
 0x133   : > { %913 = vadd.xlane.f32.xlu1 %v912_v45  ;;  %916 = vadd.xlane.f32.xlu0 %v915_v48 }
 0x137   : > { %919 = vadd.xlane.f32.xlu1 %v918_v49 }
 0x1b4   : > { %v899_v50 = vpop.xlane.xlu0 %898 }
 0x1b5   : > { %v922_v52 = vmul.f32 0.03125, %v899_v50 }
 0x1b7   : > { %v3227_v54 = vsub.f32 %v886_v34, %v922_v52  ;;  %v2309_v52 = vld [vmem:[%s3759_s23] ss:$0 sm:$0xff]  ;;  %s3763_s23 = scalar_lea.vmem %s3706_s9, %s3115_s24 }
 0x1b8   : > { %v905_v51 = vpop.xlane.xlu1 %904  ;;  %v902_v56 = vpop.xlane.xlu0 %901 }
 0x1b9   : > { %v924_v53 = vmul.f32 0.03125, %v905_v51  ;;  %v923_v58 = vmul.f32 0.03125, %v902_v56  ;;  %v938_v60 = vmul.f32 %v3227_v54, %v3227_v54 }
 0x1bb   : > { %v3229_v55 = vsub.f32 %v888_v35, %v924_v53  ;;  %v3235_v62 = vsub.f32 %v887_v36, %v923_v58  ;;  %v946_v0 = vsel %vm896_vm2, %v938_v60, 0.0 }
 0x1bc   : > { %v908_v57 = vpop.xlane.xlu1 %907  ;;  %947 = vadd.xlane.f32.xlu0 %v946_v0  ;;  %v911_v1 = vpop.xlane.xlu0 %910 }
 0x1bd   : > { %v925_v59 = vmul.f32 0.03125, %v908_v57  ;;  %v940_v61 = vmul.f32 %v3229_v55, %v3229_v55  ;;  %v926_v4 = vmul.f32 0.03125, %v911_v1  ;;  %v939_v6 = vmul.f32 %v3235_v62, %v3235_v62 }
 0x1bf   : > { %v3237_v63 = vsub.f32 %v889_v39, %v925_v59  ;;  %v952_v3 = vsel %vm896_vm2, %v940_v61, 0.0  ;;  %v3245_v8 = vsub.f32 %v890_v42, %v926_v4  ;;  %v949_v10 = vsel %vm896_vm2, %v939_v6, 0.0 }
 0x1c0   : > { %v914_v2 = vpop.xlane.xlu1 %913  ;;  %953 = vadd.xlane.f32.xlu0 %v952_v3  ;;  %950 = vadd.xlane.f32.xlu1 %v949_v10  ;;  %v917_v11 = vpop.xlane.xlu0 %916 }
 0x1c1   : > { %v927_v5 = vmul.f32 0.03125, %v914_v2  ;;  %v941_v7 = vmul.f32 %v3237_v63, %v3237_v63  ;;  %v928_v14 = vmul.f32 0.03125, %v917_v11  ;;  %v942_v16 = vmul.f32 %v3245_v8, %v3245_v8 }
 0x1c3   : > { %v3247_v9 = vsub.f32 %v891_v43, %v927_v5  ;;  %v955_v13 = vsel %vm896_vm2, %v941_v7, 0.0  ;;  %v3255_v18 = vsub.f32 %v892_v46, %v928_v14  ;;  %v958_v20 = vsel %vm896_vm2, %v942_v16, 0.0 }
 0x1c4   : > { %v920_v12 = vpop.xlane.xlu1 %919  ;;  %956 = vadd.xlane.f32.xlu1 %v955_v13  ;;  %959 = vadd.xlane.f32.xlu0 %v958_v20 }
 0x1c5   : > { %v929_v15 = vmul.f32 0.03125, %v920_v12  ;;  %v943_v17 = vmul.f32 %v3247_v9, %v3247_v9  ;;  %v944_v22 = vmul.f32 %v3255_v18, %v3255_v18 }
 0x1c7   : > { %v3257_v19 = vsub.f32 %v893_v47, %v929_v15  ;;  %v961_v21 = vsel %vm896_vm2, %v943_v17, 0.0  ;;  %v964_v24 = vsel %vm896_vm2, %v944_v22, 0.0 }
 0x1c8   : > { %962 = vadd.xlane.f32.xlu1 %v961_v21  ;;  %965 = vadd.xlane.f32.xlu0 %v964_v24 }
 0x1c9   : > { %v945_v23 = vmul.f32 %v3257_v19, %v3257_v19 }
 0x1cb   : > { %v967_v25 = vsel %vm896_vm2, %v945_v23, 0.0 }
 0x1cc   : > { %968 = vadd.xlane.f32.xlu1 %v967_v25 }
 0x249   : > { %v948_v27 = vpop.xlane.xlu0 %947 }
 0x24a   : > { %v970_v28 = vmul.f32 0.03125, %v948_v27  ;;  %v1032_v27 = vld [vmem:[%s3758_s1 + $0x10] sm:$0xff] }
 0x24c   : > { %v978_v29 = vadd.f32 1e-05, %v970_v28  ;;  %v1034_v28 = vld [vmem:[%s3758_s1 + $0x20] sm:$0xff] }
 0x24d   : > { %v951_v30 = vpop.xlane.xlu1 %950  ;;  %v954_v31 = vpop.xlane.xlu0 %953 }
 0x24e   : > { %2778 = vrsqrt.f32 %v978_v29  ;;  %v971_v32 = vmul.f32 0.03125, %v951_v30  ;;  %v972_v33 = vmul.f32 0.03125, %v954_v31  ;;  %v1035_v29 = vld [vmem:[%s3758_s1 + $0x28] sm:$0xff]  ;;  %v1036_v30 = vld [vmem:[%s3758_s1 + $0x30] sm:$0xff]  ;;  %v1037_v31 = vld [vmem:[%s3758_s1 + $0x38] sm:$0xff] }
 0x250   : > { %v979_v34 = vadd.f32 1e-05, %v971_v32  ;;  %v980_v35 = vadd.f32 1e-05, %v972_v33  ;;  %v1038_v32 = vld [vmem:[%s3758_s1 + $0x40] sm:$0xff]  ;;  %v1039_v33 = vld [vmem:[%s3758_s1 + $0x48] sm:$0xff] }
 0x251   : > { %v957_v36 = vpop.xlane.xlu1 %956  ;;  %v960_v37 = vpop.xlane.xlu0 %959 }
 0x252   : > { %2780 = vrsqrt.f32 %v979_v34  ;;  %v973_v38 = vmul.f32 0.03125, %v957_v36  ;;  %v974_v39 = vmul.f32 0.03125, %v960_v37  ;;  %v1226_v34 = vld [vmem:[%s3762_s16] sm:$0xff] }
 0x253   : > { %2782 = vrsqrt.f32 %v980_v35  ;;  %2515 = vmatprep.mubr.msk.f32.mxu1 %vm1234_vm4, %v1226_v34 }
 0x254   : > { %v981_v40 = vadd.f32 1e-05, %v973_v38  ;;  %v982_v41 = vadd.f32 1e-05, %v974_v39  ;;  %v1186_v39 = vld [vmem:[%s3761_s19] sm:$0xff] }
 0x255   : > { %v963_v42 = vpop.xlane.xlu1 %962  ;;  %v966_v43 = vpop.xlane.xlu0 %965 }
 0x256   : > { %2784 = vrsqrt.f32 %v981_v40  ;;  %v975_v44 = vmul.f32 0.03125, %v963_v42  ;;  %v976_v45 = vmul.f32 0.03125, %v966_v43  ;;  %v1191_v40 = vld [vmem:[%s3139_s20] sm:$0xff] }
 0x257   : > { %2786 = vrsqrt.f32 %v982_v41 }
 0x258   : > { %v2779_v46 = vpop.eup %2778  ;;  %v983_v47 = vadd.f32 1e-05, %v975_v44  ;;  %v984_v48 = vadd.f32 1e-05, %v976_v45 }
 0x259   : > { %v969_v49 = vpop.xlane.xlu1 %968  ;;  %v994_v50 = vmul.f32 %v2779_v46, %v3227_v54  ;;  %v2310_v54 = vld [vmem:[%s3760_s5] ss:$0 sm:$0xff]  ;;  %s3764_s5 = scalar_lea.vmem %s3707_s10, %s3115_s24 }
 0x25a   : > { %2788 = vrsqrt.f32 %v983_v47  ;;  %v977_v51 = vmul.f32 0.03125, %v969_v49  ;;  %v1188_v47 = vld [vmem:[%s3761_s19 + $0x10] sm:$0xff]  ;;  %v1187_v49 = vld [vmem:[%s3761_s19 + $0x8] sm:$0xff] }
 0x25b   : > { %2790 = vrsqrt.f32 %v984_v48  ;;  %v1008_v59 = vmul.f32 %v2309_v52, %v994_v50  ;;  %v1193_v48 = vld [vmem:[%s3139_s20 + $0x10] sm:$0xff]  ;;  %v1192_v50 = vld [vmem:[%s3139_s20 + $0x8] sm:$0xff] }
 0x25c   : > { %v2781_v53 = vpop.eup %2780  ;;  %v985_v56 = vadd.f32 1e-05, %v977_v51 }
 0x25d   : > { %v2783_v57 = vpop.eup %2782  ;;  %v995_v58 = vmul.f32 %v2781_v53, %v3235_v62  ;;  %v1022_v2 = vadd.f32 %v2310_v54, %v1008_v59 }
 0x25e   : > { %2792 = vrsqrt.f32 %v985_v56  ;;  %v996_v60 = vmul.f32 %v2783_v57, %v3229_v55  ;;  %v1189_v56 = vld [vmem:[%s3761_s19 + $0x18] sm:$0xff] }
 0x25f   : > { %v1009_v61 = vmul.f32 %v2309_v52, %v995_v58  ;;  %v1194_v57 = vld [vmem:[%s3139_s20 + $0x18] sm:$0xff] }
 0x260   : > { %v2785_v0 = vpop.eup %2784  ;;  %v1010_v5 = vmul.f32 %v2309_v52, %v996_v60 }
 0x261   : > { %v2787_v1 = vpop.eup %2786  ;;  %v1023_v3 = vadd.f32 %v2310_v54, %v1009_v61  ;;  %v997_v4 = vmul.f32 %v2785_v0, %v3237_v63 }
 0x262   : > { %v998_v6 = vmul.f32 %v2787_v1, %v3245_v8  ;;  %v1024_v12 = vadd.f32 %v2310_v54, %v1010_v5 }
 0x263   : > { %v2614_v62 = vpack.c.bf16 %v1023_v3, %v1022_v2  ;;  %v1011_v7 = vmul.f32 %v2309_v52, %v997_v4  ;;  %v1190_v2 = vld [vmem:[%s3761_s19 + $0x20] sm:$0xff]  ;;  %s3765_s19 = sld [smem:[#allocation23_spill]] (!%p2341_p1) }
 0x264   : > { %v2789_v10 = vpop.eup %2788  ;;  %v1012_v55 = vmul.f32 %v2309_v52, %v998_v6  ;;  %v1195_v3 = vld [vmem:[%s3139_s20 + $0x20] sm:$0xff] }
 0x265   : > { %v2791_v11 = vpop.eup %2790  ;;  %2615 = vmatprep.subr.bf16.mxu0 %v2614_v62  ;;  %v1025_v13 = vadd.f32 %v2310_v54, %v1011_v7  ;;  %v999_v14 = vmul.f32 %v2789_v10, %v3247_v9 }
 0x266   : > { %2617 = vmatpush3.bf16.msra.mxu0 %v2614_v62  ;;  %v1000_v15 = vmul.f32 %v2791_v11, %v3255_v18  ;;  %v1026_v63 = vadd.f32 %v2310_v54, %v1012_v55  ;;  %v1031_v18 = vld [vmem:[%s3758_s1 + $0x8] sm:$0xff] }
 0x267   : > { %v2618_v16 = vpack.c.bf16 %v1025_v13, %v1024_v12  ;;  %v1013_v17 = vmul.f32 %v2309_v52, %v999_v14 }
 0x268   : > { %v2793_v20 = vpop.eup %2792  ;;  %v1014_v22 = vmul.f32 %v2309_v52, %v1000_v15 }
 0x269   : > { %2619 = vmatprep.subr.bf16.mxu0 %v2618_v16  ;;  %v1027_v21 = vadd.f32 %v2310_v54, %v1013_v17  ;;  %v1001_v8 = vmul.f32 %v2793_v20, %v3257_v19  ;;  %v1033_v19 = vld [vmem:[%s3758_s1 + $0x18] sm:$0xff] }
 0x26a   : > { %2621 = vmatpush3.bf16.msra.mxu0 %v2618_v16  ;;  %v1028_v25 = vadd.f32 %v2310_v54, %v1014_v22 }
 0x26b   : > { %v2622_v23 = vpack.c.bf16 %v1027_v21, %v1026_v63  ;;  %v1015_v24 = vmul.f32 %v2309_v52, %v1001_v8 }
 0x26d   : > { %2623 = vmatprep.subr.bf16.mxu0 %v2622_v23  ;;  %v1029_v26 = vadd.f32 %v2310_v54, %v1015_v24 }
 0x26e   : > { %2625 = vmatpush3.bf16.msra.mxu0 %v2622_v23 }
 0x26f   : > { %v2626_v9 = vpack.c.bf16 %v1029_v26, %v1028_v25 }
 0x271   : > { %2627 = vmatprep.subr.bf16.mxu0 %v2626_v9 }
 0x272   : > { %2629 = vmatpush3.bf16.msra.mxu0 %v2626_v9 }
 0x275   : > { %2481 = vmatmul.mubr.msk.f32.vlgmr.msra.gmra.mrb[0].mxu0 %vm1040_vm3, %v1031_v18 }
 0x276   : > { %2483 = vmatprep.mubr.msk.f32.mxu0 %vm1040_vm3, %v1032_v27  ;;  %v1227_v27 = vld [vmem:[%s3762_s16 + $0x8] sm:$0xff] }
 0x279   : > { %2484 = vmatmul.mubr.msk.f32.gmra.mrb[2].mxu0 %vm1040_vm3, %v1033_v19  ;;  %v1228_v19 = vld [vmem:[%s3762_s16 + $0x10] sm:$0xff] }
 0x27a   : > { %2486 = vmatprep.mubr.msk.f32.mxu0 %vm1040_vm3, %v1034_v28  ;;  %v1229_v28 = vld [vmem:[%s3762_s16 + $0x18] sm:$0xff] }
 0x27d   : > { %2487 = vmatmul.mubr.msk.f32.gmra.mrb[4].mxu0 %vm1040_vm3, %v1035_v29  ;;  %v1230_v29 = vld [vmem:[%s3762_s16 + $0x20] sm:$0xff] }
 0x27e   : > { %2489 = vmatprep.mubr.msk.f32.mxu0 %vm1040_vm3, %v1036_v30  ;;  %v1231_v30 = vld [vmem:[%s3762_s16 + $0x28] sm:$0xff] }
 0x281   : > { %2490 = vmatmul.mubr.msk.f32.gmra.mrb[6].mxu0 %vm1040_vm3, %v1037_v31  ;;  %v1232_v31 = vld [vmem:[%s3762_s16 + $0x30] sm:$0xff] }
 0x282   : > { %2492 = vmatprep.mubr.msk.f32.mxu0 %vm1040_vm3, %v1038_v32  ;;  %v1233_v32 = vld [vmem:[%s3762_s16 + $0x38] sm:$0xff] }
 0x285   : > { %2493 = vmatmul.mubr.msk.f32.gmra.mrb[8].mxu0 %vm1040_vm3, %v1039_v33 }
 0x348   : > { %v2482_v35 = vpop.f32.mrb[0].mxu0 }
 0x349   : > { %v1137_v36 = vpop.f32.mrb[1].mxu0  ;;  %v1197_v0 = vmul.f32 %v2482_v35, %v1187_v49  ;;  %v1212_v1 = vmul.f32 %v2482_v35, %v1192_v50 }
 0x34a   : > { %v1196_v42 = vmul.f32 %v1186_v39, %v1137_v36  ;;  %v1211_v43 = vmul.f32 %v1191_v40, %v1137_v36 }
 0x34c   : > { %v2485_v37 = vpop.f32.mrb[2].mxu0 }
 0x34d   : > { %v1147_v38 = vpop.f32.mrb[3].mxu0  ;;  %v1199_v7 = vmul.f32 %v2485_v37, %v1189_v56  ;;  %v1214_v10 = vmul.f32 %v2485_v37, %v1194_v57 }
 0x34e   : > { %v1198_v58 = vmul.f32 %v1188_v47, %v1147_v38  ;;  %v1213_v59 = vmul.f32 %v1193_v48, %v1147_v38 }
 0x350   : > { %v2488_v41 = vpop.f32.mrb[4].mxu0 }
 0x351   : > { %v1201_v44 = vmul.f32 %v2488_v41, %v1191_v40  ;;  %v1216_v45 = vmul.f32 %v2488_v41, %v1186_v39  ;;  %v1157_v46 = vpop.f32.mrb[5].mxu0 }
 0x352   : > { %v1200_v14 = vmul.f32 %v1190_v2, %v1157_v46  ;;  %v1215_v55 = vmul.f32 %v1195_v3, %v1157_v46 }
 0x353   : > { %v1221_v51 = vadd.f32 %v1216_v45, %v1211_v43  ;;  %v1206_v52 = vsub.f32 %v1196_v42, %v1201_v44 }
 0x354   : > { %v2491_v53 = vpop.f32.mrb[6].mxu0 }
 0x355   : > { %v1203_v54 = vmul.f32 %v2491_v53, %v1193_v48  ;;  %v1218_v60 = vmul.f32 %v2491_v53, %v1188_v47  ;;  %v1167_v61 = vpop.f32.mrb[7].mxu0 }
 0x356   : > { %v1202_v4 = vmul.f32 %v1192_v50, %v1167_v61  ;;  %v1217_v5 = vmul.f32 %v1187_v49, %v1167_v61 }
 0x357   : > { %v1208_v6 = vsub.f32 %v1198_v58, %v1203_v54  ;;  %v1223_v62 = vadd.f32 %v1218_v60, %v1213_v59 }
 0x358   : > { %v1222_v11 = vadd.f32 %v1217_v5, %v1212_v1  ;;  %v2494_v12 = vpop.f32.mrb[8].mxu0  ;;  %v1207_v13 = vsub.f32 %v1197_v0, %v1202_v4 }
 0x359   : > { %v1205_v15 = vmul.f32 %v2494_v12, %v1195_v3  ;;  %v1220_v16 = vmul.f32 %v2494_v12, %v1190_v2  ;;  %v1177_v17 = vpop.f32.mrb[9].mxu0 }
 0x35a   : > { %v1204_v20 = vmul.f32 %v1194_v57, %v1177_v17  ;;  %v1219_v63 = vmul.f32 %v1189_v56, %v1177_v17  ;;  %v2630_v21 = vpack.c.bf16 %v1207_v13, %v1206_v52  ;;  %v2642_v8 = vpack.c.bf16 %v1223_v62, %v1222_v11 }
 0x35b   : > { %v1210_v22 = vsub.f32 %v1200_v14, %v1205_v15  ;;  %v1225_v23 = vadd.f32 %v1220_v16, %v1215_v55 }
 0x35c   : > { %v1209_v24 = vsub.f32 %v1199_v7, %v1204_v20  ;;  %v1224_v25 = vadd.f32 %v1219_v63, %v1214_v10  ;;  %2631 = vmatprep.subr.bf16.mxu1 %v2630_v21 }
 0x35d   : > { %2633 = vmatpush3.bf16.msra.mxu1 %v2630_v21  ;;  %v2638_v26 = vpack.c.bf16 %v1221_v51, %v1210_v22 }
 0x35e   : > { %v2634_v9 = vpack.c.bf16 %v1209_v24, %v1208_v6  ;;  %v2646_v18 = vpack.c.bf16 %v1225_v23, %v1224_v25 }
 0x360   : > { %2635 = vmatprep.subr.bf16.mxu1 %v2634_v9 }
 0x361   : > { %2637 = vmatpush3.bf16.msra.mxu1 %v2634_v9 }
 0x362   : > { %2639 = vmatprep.subr.bf16.mxu1 %v2638_v26 }
 0x365   : > { %2641 = vmatpush3.bf16.msra.mxu1 %v2638_v26 }
 0x366   : > { %2643 = vmatprep.subr.bf16.mxu1 %v2642_v8 }
 0x369   : > { %2645 = vmatpush3.bf16.msra.mxu1 %v2642_v8 }
 0x36a   : > { %2647 = vmatprep.subr.bf16.mxu1 %v2646_v18 }
 0x36d   : > { %2649 = vmatpush3.bf16.msra.mxu1 %v2646_v18  ;;  %v1498_v18 = vld [vmem:[%s3157_s4] sm:$0xff] }
 0x370   : > { %2516 = vmatmul.mubr.msk.f32.vlgmr.msra.gmra.mrb[0].mxu1 %vm1234_vm4, %v1227_v27  ;;  %v1499_v27 = vld [vmem:[%s3157_s4 + $0x8] sm:$0xff] }
 0x371   : > { %2518 = vmatprep.mubr.msk.f32.mxu1 %vm1234_vm4, %v1228_v19  ;;  %v2650_v19 = vpack.c.bf16 %v1499_v27, %v1498_v18 }
 0x373   : > { %2651 = vmatprep.subr.bf16.mxu0 %v2650_v19 }
 0x374   : > { %2519 = vmatmul.mubr.msk.f32.gmra.mrb[2].mxu1 %vm1234_vm4, %v1229_v28  ;;  %2653 = vmatpush3.bf16.msra.mxu0 %v2650_v19  ;;  %v1500_v28 = vld [vmem:[%s3157_s4 + $0x10] sm:$0xff] }
 0x375   : > { %2521 = vmatprep.mubr.msk.f32.mxu1 %vm1234_vm4, %v1230_v29  ;;  %v1501_v29 = vld [vmem:[%s3157_s4 + $0x18] sm:$0xff] }
 0x378   : > { %2522 = vmatmul.mubr.msk.f32.gmra.mrb[4].mxu1 %vm1234_vm4, %v1231_v30  ;;  %v2654_v30 = vpack.c.bf16 %v1501_v29, %v1500_v28  ;;  %v1856_v28 = vld [vmem:[%s3163_s0 + $0x10] sm:$0xff]  ;;  %v1857_v29 = vld [vmem:[%s3163_s0 + $0x18] sm:$0xff] }
 0x379   : > { %2524 = vmatprep.mubr.msk.f32.mxu1 %vm1234_vm4, %v1232_v31 }
 0x37a   : > { %2655 = vmatprep.subr.bf16.mxu0 %v2654_v30 }
 0x37b   : > { %2657 = vmatpush3.bf16.msra.mxu0 %v2654_v30  ;;  %v2662_v30 = vpack.c.bf16 %v1857_v29, %v1856_v28 }
 0x37c   : > { %2525 = vmatmul.mubr.msk.f32.gmra.mrb[6].mxu1 %vm1234_vm4, %v1233_v32 }
 0x443   : > { %v2517_v33 = vpop.f32.mrb[0].mxu1 }
 0x444   : > { %v1325_v34 = vpop.f32.mrb[1].mxu1  ;;  %v1369_v35 = vsel %vm896_vm2, %v2517_v33, 0.0 }
 0x445   : > { %1370 = vadd.xlane.f32.xlu1 %v1369_v35  ;;  %v1366_v36 = vsel %vm896_vm2, %v1325_v34, 0.0 }
 0x446   : > { %1367 = vadd.xlane.f32.xlu0 %v1366_v36 }
 0x447   : > { %v2520_v37 = vpop.f32.mrb[2].mxu1 }
 0x448   : > { %v1335_v38 = vpop.f32.mrb[3].mxu1  ;;  %v1375_v39 = vsel %vm896_vm2, %v2520_v37, 0.0 }
 0x449   : > { %1376 = vadd.xlane.f32.xlu1 %v1375_v39  ;;  %v1372_v40 = vsel %vm896_vm2, %v1335_v38, 0.0 }
 0x44a   : > { %1373 = vadd.xlane.f32.xlu0 %v1372_v40 }
 0x44b   : > { %v2523_v41 = vpop.f32.mrb[4].mxu1 }
 0x44c   : > { %v1345_v42 = vpop.f32.mrb[5].mxu1  ;;  %v1381_v43 = vsel %vm896_vm2, %v2523_v41, 0.0 }
 0x44d   : > { %1382 = vadd.xlane.f32.xlu1 %v1381_v43  ;;  %v1378_v44 = vsel %vm896_vm2, %v1345_v42, 0.0 }
 0x44e   : > { %1379 = vadd.xlane.f32.xlu0 %v1378_v44 }
 0x44f   : > { %v2526_v45 = vpop.f32.mrb[6].mxu1 }
 0x450   : > { %v1355_v46 = vpop.f32.mrb[7].mxu1  ;;  %v1387_v47 = vsel %vm896_vm2, %v2526_v45, 0.0 }
 0x451   : > { %1388 = vadd.xlane.f32.xlu1 %v1387_v47  ;;  %v1384_v48 = vsel %vm896_vm2, %v1355_v46, 0.0 }
 0x452   : > { %1385 = vadd.xlane.f32.xlu0 %v1384_v48 }
 0x4d2   : > { %v1371_v49 = vpop.xlane.xlu1 %1370 }
 0x4d3   : > { %v1391_v50 = vmul.f32 0.03125, %v1371_v49  ;;  %v1368_v51 = vpop.xlane.xlu0 %1367 }
 0x4d4   : > { %v1390_v52 = vmul.f32 0.03125, %v1368_v51 }
 0x4d5   : > { %v3375_v53 = vsub.f32 %v2517_v33, %v1391_v50 }
 0x4d6   : > { %v3377_v56 = vsub.f32 %v1325_v34, %v1390_v52  ;;  %v1377_v57 = vpop.xlane.xlu1 %1376 }
 0x4d7   : > { %v1393_v58 = vmul.f32 0.03125, %v1377_v57  ;;  %v1374_v59 = vpop.xlane.xlu0 %1373  ;;  %v1407_v54 = vmul.f32 %v3375_v53, %v3375_v53 }
 0x4d8   : > { %v1392_v60 = vmul.f32 0.03125, %v1374_v59  ;;  %v1406_v61 = vmul.f32 %v3377_v56, %v3377_v56 }
 0x4d9   : > { %v3383_v0 = vsub.f32 %v2520_v37, %v1393_v58  ;;  %v1417_v1 = vsel %vm896_vm2, %v1407_v54, 0.0  ;;  %v2329_v58 = vld [vmem:[%s3763_s23] ss:$0 sm:$0xff] }
 0x4da   : > { %v3386_v2 = vsub.f32 %v1335_v38, %v1392_v60  ;;  %v1383_v3 = vpop.xlane.xlu1 %1382  ;;  %1418 = vadd.xlane.f32.xlu1 %v1417_v1  ;;  %v1414_v4 = vsel %vm896_vm2, %v1406_v61, 0.0 }
 0x4db   : > { %v1395_v5 = vmul.f32 0.03125, %v1383_v3  ;;  %v1380_v6 = vpop.xlane.xlu0 %1379  ;;  %1415 = vadd.xlane.f32.xlu0 %v1414_v4  ;;  %v1409_v62 = vmul.f32 %v3383_v0, %v3383_v0  ;;  %v2330_v3 = vld [vmem:[%s3764_s5] ss:$0 sm:$0xff]  ;;  %s3766_s5 = sld [smem:[#allocation24_spill]] (!%p2341_p1) }
 0x4dc   : > { %v1394_v7 = vmul.f32 0.03125, %v1380_v6  ;;  %v1408_v10 = vmul.f32 %v3386_v2, %v3386_v2 }
 0x4dd   : > { %v3393_v11 = vsub.f32 %v2523_v41, %v1395_v5  ;;  %v1423_v12 = vsel %vm896_vm2, %v1409_v62, 0.0 }
 0x4de   : > { %v3396_v13 = vsub.f32 %v1345_v42, %v1394_v7  ;;  %1424 = vadd.xlane.f32.xlu1 %v1423_v12  ;;  %v1389_v14 = vpop.xlane.xlu1 %1388  ;;  %v1420_v55 = vsel %vm896_vm2, %v1408_v10, 0.0 }
 0x4df   : > { %v1397_v15 = vmul.f32 0.03125, %v1389_v14  ;;  %1421 = vadd.xlane.f32.xlu0 %v1420_v55  ;;  %v1386_v16 = vpop.xlane.xlu0 %1385  ;;  %v1411_v17 = vmul.f32 %v3393_v11, %v3393_v11 }
 0x4e0   : > { %v1396_v20 = vmul.f32 0.03125, %v1386_v16  ;;  %v1410_v63 = vmul.f32 %v3396_v13, %v3396_v13 }
 0x4e1   : > { %v3403_v21 = vsub.f32 %v2526_v45, %v1397_v15  ;;  %v1429_v8 = vsel %vm896_vm2, %v1411_v17, 0.0 }
 0x4e2   : > { %v3406_v22 = vsub.f32 %v1355_v46, %v1396_v20  ;;  %1430 = vadd.xlane.f32.xlu1 %v1429_v8  ;;  %v1426_v23 = vsel %vm896_vm2, %v1410_v63, 0.0 }
 0x4e3   : > { %1427 = vadd.xlane.f32.xlu0 %v1426_v23  ;;  %v1413_v24 = vmul.f32 %v3403_v21, %v3403_v21 }
 0x4e4   : > { %v1412_v25 = vmul.f32 %v3406_v22, %v3406_v22 }
 0x4e5   : > { %v1435_v26 = vsel %vm896_vm2, %v1413_v24, 0.0 }
 0x4e6   : > { %1436 = vadd.xlane.f32.xlu1 %v1435_v26  ;;  %v1432_v9 = vsel %vm896_vm2, %v1412_v25, 0.0 }
 0x4e7   : > { %1433 = vadd.xlane.f32.xlu0 %v1432_v9 }
 0x567   : > { %v1419_v31 = vpop.xlane.xlu1 %1418 }
 0x568   : > { %v1439_v32 = vmul.f32 0.03125, %v1419_v31  ;;  %v1416_v33 = vpop.xlane.xlu0 %1415  ;;  %v1858_v31 = vld [vmem:[%s3163_s0 + $0x20] sm:$0xff] }
 0x569   : > { %v1438_v34 = vmul.f32 0.03125, %v1416_v33 }
 0x56a   : > { %v1447_v35 = vadd.f32 1e-05, %v1439_v32  ;;  %v1859_v32 = vld [vmem:[%s3163_s0 + $0x28] sm:$0xff] }
 0x56b   : > { %v1446_v36 = vadd.f32 1e-05, %v1438_v34  ;;  %v1425_v37 = vpop.xlane.xlu1 %1424  ;;  %v2666_v33 = vpack.c.bf16 %v1859_v32, %v1858_v31  ;;  %v1860_v34 = vld [vmem:[%s3163_s0 + $0x30] sm:$0xff]  ;;  %v2946_v31 = vmov -1.0  }
 0x56c   : > { %2794 = vrsqrt.f32 %v1447_v35  ;;  %v1441_v38 = vmul.f32 0.03125, %v1425_v37  ;;  %v1422_v39 = vpop.xlane.xlu0 %1421  ;;  %v1861_v35 = vld [vmem:[%s3163_s0 + $0x38] sm:$0xff]  ;;  %v1862_v37 = vld [vmem:[%s3163_s0 + $0x40] sm:$0xff] }
 0x56d   : > { %2796 = vrsqrt.f32 %v1446_v36  ;;  %v1440_v40 = vmul.f32 0.03125, %v1422_v39  ;;  %v2670_v36 = vpack.c.bf16 %v1861_v35, %v1860_v34 }
 0x56e   : > { %v1449_v41 = vadd.f32 1e-05, %v1441_v38  ;;  %v1863_v38 = vld [vmem:[%s3163_s0 + $0x48] sm:$0xff] }
 0x56f   : > { %v1448_v42 = vadd.f32 1e-05, %v1440_v40  ;;  %v1431_v43 = vpop.xlane.xlu1 %1430  ;;  %v2674_v39 = vpack.c.bf16 %v1863_v38, %v1862_v37  ;;  %v1864_v40 = vld [vmem:[%s3163_s0 + $0x50] sm:$0xff] }
 0x570   : > { %2798 = vrsqrt.f32 %v1449_v41  ;;  %v1443_v44 = vmul.f32 0.03125, %v1431_v43  ;;  %v1428_v45 = vpop.xlane.xlu0 %1427  ;;  %v1865_v41 = vld [vmem:[%s3163_s0 + $0x58] sm:$0xff]  ;;  %v1866_v43 = vld [vmem:[%s3163_s0 + $0x60] sm:$0xff] }
 0x571   : > { %2800 = vrsqrt.f32 %v1448_v42  ;;  %v1442_v46 = vmul.f32 0.03125, %v1428_v45  ;;  %v2678_v42 = vpack.c.bf16 %v1865_v41, %v1864_v40 }
 0x572   : > { %v1451_v47 = vadd.f32 1e-05, %v1443_v44  ;;  %v1867_v44 = vld [vmem:[%s3163_s0 + $0x68] sm:$0xff] }
 0x573   : > { %v1450_v48 = vadd.f32 1e-05, %v1442_v46  ;;  %v1437_v49 = vpop.xlane.xlu1 %1436  ;;  %v2682_v45 = vpack.c.bf16 %v1867_v44, %v1866_v43  ;;  %v1868_v46 = vld [vmem:[%s3163_s0 + $0x70] sm:$0xff] }
 0x574   : > { %2802 = vrsqrt.f32 %v1451_v47  ;;  %v1445_v50 = vmul.f32 0.03125, %v1437_v49  ;;  %v1434_v51 = vpop.xlane.xlu0 %1433  ;;  %v1869_v47 = vld [vmem:[%s3163_s0 + $0x78] sm:$0xff]  ;;  %v2331_v49 = vld [vmem:[%s713_s15] ss:$0 sm:$0xff] }
 0x575   : > { %2804 = vrsqrt.f32 %v1450_v48  ;;  %v1444_v52 = vmul.f32 0.03125, %v1434_v51  ;;  %v2686_v48 = vpack.c.bf16 %v1869_v47, %v1868_v46 }
 0x576   : > { %v2795_v57 = vpop.eup %2794  ;;  %v1453_v59 = vadd.f32 1e-05, %v1445_v50 }
 0x577   : > { %v2797_v54 = vpop.eup %2796  ;;  %v1463_v60 = vmul.f32 %v2795_v57, %v3375_v53  ;;  %v1452_v61 = vadd.f32 1e-05, %v1444_v52 }
 0x578   : > { %2806 = vrsqrt.f32 %v1453_v59  ;;  %v1462_v1 = vmul.f32 %v2797_v54, %v3377_v56 }
 0x579   : > { %v1477_v4 = vmul.f32 %v2329_v58, %v1463_v60  ;;  %2808 = vrsqrt.f32 %v1452_v61 }
 0x57a   : > { %v2799_v5 = vpop.eup %2798  ;;  %v1476_v6 = vmul.f32 %v2329_v58, %v1462_v1 }
 0x57b   : > { %v2801_v62 = vpop.eup %2800  ;;  %v1465_v7 = vmul.f32 %v2799_v5, %v3383_v0  ;;  %v1491_v53 = vadd.f32 %v2330_v3, %v1477_v4 }
 0x57c   : > { %v1490_v10 = vadd.f32 %v2330_v3, %v1476_v6  ;;  %v1464_v12 = vmul.f32 %v2801_v62, %v3386_v2 }
 0x57d   : > { %v1479_v14 = vmul.f32 %v2329_v58, %v1465_v7 }
 0x57e   : > { %v2803_v55 = vpop.eup %2802  ;;  %2535 = vmatprep.mubr.msk.f32.mxu0 %vm896_vm2, %v1490_v10  ;;  %v1478_v56 = vmul.f32 %v2329_v58, %v1464_v12 }
 0x57f   : > { %v2805_v15 = vpop.eup %2804  ;;  %2536 = vmatmul.mubr.msk.f32.vlgmr.msra.gmra.mrb[10].mxu0 %vm896_vm2, %v1491_v53  ;;  %v1467_v16 = vmul.f32 %v2803_v55, %v3393_v11  ;;  %v1493_v63 = vadd.f32 %v2330_v3, %v1479_v14 }
 0x580   : > { %v1492_v17 = vadd.f32 %v2330_v3, %v1478_v56  ;;  %v1466_v20 = vmul.f32 %v2805_v15, %v3396_v13 }
 0x581   : > { %v1481_v8 = vmul.f32 %v2329_v58, %v1467_v16 }
 0x582   : > { %v2807_v0 = vpop.eup %2806  ;;  %2538 = vmatprep.mubr.msk.f32.mxu0 %vm896_vm2, %v1492_v17  ;;  %v1480_v2 = vmul.f32 %v2329_v58, %v1466_v20 }
 0x583   : > { %v2809_v23 = vpop.eup %2808  ;;  %2539 = vmatmul.mubr.msk.f32.gmra.mrb[12].mxu0 %vm896_vm2, %v1493_v63  ;;  %v1469_v24 = vmul.f32 %v2807_v0, %v3403_v21  ;;  %v1495_v26 = vadd.f32 %v2330_v3, %v1481_v8  ;;  %v1854_v21 = vld [vmem:[%s3163_s0] sm:$0xff] }
 0x584   : > { %v1494_v25 = vadd.f32 %v2330_v3, %v1480_v2  ;;  %v1468_v11 = vmul.f32 %v2809_v23, %v3406_v22  ;;  %v1855_v22 = vld [vmem:[%s3163_s0 + $0x8] sm:$0xff] }
 0x585   : > { %v1483_v13 = vmul.f32 %v2329_v58, %v1469_v24  ;;  %v2658_v19 = vpack.c.bf16 %v1855_v22, %v1854_v21 }
 0x586   : > { %2541 = vmatprep.mubr.msk.f32.mxu0 %vm896_vm2, %v1494_v25  ;;  %v1482_v9 = vmul.f32 %v2329_v58, %v1468_v11 }
 0x587   : > { %2542 = vmatmul.mubr.msk.f32.gmra.mrb[14].mxu0 %vm896_vm2, %v1495_v26  ;;  %v1497_v27 = vadd.f32 %v2330_v3, %v1483_v13  ;;  %2659 = vmatprep.subr.bf16.mxu1 %v2658_v19 }
 0x588   : > { %v1496_v18 = vadd.f32 %v2330_v3, %v1482_v9  ;;  %2661 = vmatpush3.bf16.msra.mxu1 %v2658_v19 }
 0x589   : > { %2663 = vmatprep.subr.bf16.mxu1 %v2662_v30 }
 0x58a   : > { %2544 = vmatprep.mubr.msk.f32.mxu0 %vm896_vm2, %v1496_v18 }
 0x58b   : > { %2545 = vmatmul.mubr.msk.f32.gmra.mrb[16].mxu0 %vm896_vm2, %v1497_v27 }
 0x58c   : > { %2665 = vmatpush3.bf16.msra.mxu1 %v2662_v30 }
 0x58d   : > { %2667 = vmatprep.subr.bf16.mxu1 %v2666_v33 }
 0x590   : > { %2669 = vmatpush3.bf16.msra.mxu1 %v2666_v33 }
 0x591   : > { %2671 = vmatprep.subr.bf16.mxu1 %v2670_v36 }
 0x594   : > { %2673 = vmatpush3.bf16.msra.mxu1 %v2670_v36 }
 0x595   : > { %2675 = vmatprep.subr.bf16.mxu1 %v2674_v39 }
 0x598   : > { %2677 = vmatpush3.bf16.msra.mxu1 %v2674_v39 }
 0x599   : > { %2679 = vmatprep.subr.bf16.mxu1 %v2678_v42 }
 0x59c   : > { %2681 = vmatpush3.bf16.msra.mxu1 %v2678_v42 }
 0x59d   : > { %2683 = vmatprep.subr.bf16.mxu1 %v2682_v45 }
 0x5a0   : > { %2685 = vmatpush3.bf16.msra.mxu1 %v2682_v45 }
 0x5a1   : > { %2687 = vmatprep.subr.bf16.mxu1 %v2686_v48 }
 0x5a4   : > { %2689 = vmatpush3.bf16.msra.mxu1 %v2686_v48 }
 0x652   : > { %v2537_v50 = vpop.f32.mrb[10].mxu0 }
 0x653   : > { %v1605_v51 = vadd.f32 %v2537_v50, %v2331_v49  ;;  %v1599_v52 = vpop.f32.mrb[11].mxu0 }
 0x654   : > { %v1600_v57 = vadd.f32 %v2331_v49, %v1599_v52 }
 0x655   : > { %v1647_v58 = vmul.f32 0.70710677, %v1605_v51  ;;  %v3490_v18 = vmul.f32 0.5, %v1605_v51 }
 0x656   : > { %v1646_v59 = vmul.f32 0.70710677, %v1600_v57  ;;  %v2540_v54 = vpop.f32.mrb[12].mxu0  ;;  %v3492_v22 = vmul.f32 0.5, %v1600_v57 }
 0x657   : > { %v1671_v60 = vand.u32 2147483647, %v1647_v58  ;;  %v3466_v61 = vadd.f32 %v2540_v54, %v2331_v49  ;;  %v1609_v1 = vpop.f32.mrb[13].mxu0  ;;  %vm1655_vm5 = vcmp.ge.f32.partialorder %v1647_v58, 0.0 }
 0x658   : > { %v1670_v3 = vand.u32 2147483647, %v1646_v59  ;;  %v3468_v4 = vadd.f32 %v2331_v49, %v1609_v1  ;;  %vm1654_vm6 = vcmp.ge.f32.partialorder %v1646_v59, 0.0  ;;  %v3499_v32 = vsel %vm1655_vm5, 1.0, %v2946_v31 }
 0x659   : > { %v1679_v5 = vmul.f32 0.3275911, %v1671_v60  ;;  %v3471_v62 = vmul.f32 0.70710677, %v3466_v61  ;;  %v1783_v63 = vsub.f32 0.0, %v1671_v60  ;;  %v3502_v33 = vsel %vm1654_vm6, 1.0, %v2946_v31 }
 0x65a   : > { %v1678_v6 = vmul.f32 0.3275911, %v1670_v3  ;;  %v3474_v10 = vmul.f32 0.70710677, %v3468_v4  ;;  %v2543_v12 = vpop.f32.mrb[14].mxu0  ;;  %v1782_v24 = vsub.f32 0.0, %v1670_v3 }
 0x65b   : > { %v1687_v7 = vadd.f32 1.0, %v1679_v5  ;;  %v1673_v14 = vand.u32 2147483647, %v3471_v62  ;;  %v1619_v55 = vpop.f32.mrb[15].mxu0  ;;  %v3478_v17 = vadd.f32 %v2543_v12, %v2331_v49  ;;  %v1791_v13 = vmul.f32 %v1783_v63, %v1671_v60 }
 0x65c   : > { %v1686_v53 = vadd.f32 1.0, %v1678_v6  ;;  %v1672_v16 = vand.u32 2147483647, %v3474_v10  ;;  %v3480_v0 = vadd.f32 %v2331_v49, %v1619_v55  ;;  %v1790_v19 = vmul.f32 %v1782_v24, %v1670_v3 }
 0x65d   : > { %2810 = vrcp.f32 %v1687_v7  ;;  %v1681_v56 = vmul.f32 0.3275911, %v1673_v14  ;;  %v3483_v23 = vmul.f32 0.70710677, %v3478_v17  ;;  %v1785_v27 = vsub.f32 0.0, %v1673_v14 }
 0x65e   : > { %2812 = vrcp.f32 %v1686_v53  ;;  %v2546_v15 = vpop.f32.mrb[16].mxu0  ;;  %v1680_v2 = vmul.f32 0.3275911, %v1672_v16  ;;  %v3486_v25 = vmul.f32 0.70710677, %v3480_v0  ;;  %vm1657_vm7 = vcmp.ge.f32.partialorder %v3471_v62, 0.0 }
 0x65f   : > { %v1629_v20 = vpop.f32.mrb[17].mxu0  ;;  %v1689_v8 = vadd.f32 1.0, %v1681_v56  ;;  %v1675_v26 = vand.u32 2147483647, %v3483_v23  ;;  %v3494_v29 = vadd.f32 %v2546_v15, %v2331_v49  ;;  %v1800_v38 = vmul.f32 1.442695, %v1791_v13 }
 0x660   : > { %v1688_v11 = vadd.f32 1.0, %v1680_v2  ;;  %v1674_v9 = vand.u32 2147483647, %v3486_v25  ;;  %v3504_v35 = vadd.f32 %v2331_v49, %v1629_v20  ;;  %v1793_v40 = vmul.f32 %v1785_v27, %v1673_v14 }
 0x661   : > { %2814 = vrcp.f32 %v1689_v8  ;;  %v1683_v21 = vmul.f32 0.3275911, %v1675_v26  ;;  %v1784_v41 = vsub.f32 0.0, %v1672_v16  ;;  %v3511_v42 = vmul.f32 0.70710677, %v3494_v29 }
 0x662   : > { %2816 = vrcp.f32 %v1688_v11  ;;  %v1682_v28 = vmul.f32 0.3275911, %v1674_v9  ;;  %v1798_v44 = vmul.f32 1.442695, %v1790_v19  ;;  %v3514_v45 = vmul.f32 0.70710677, %v3504_v35 }
 0x663   : > { %v1691_v34 = vadd.f32 1.0, %v1683_v21  ;;  %v1787_v46 = vsub.f32 0.0, %v1675_v26  ;;  %v1786_v47 = vsub.f32 0.0, %v1674_v9  ;;  %v1677_v48 = vand.u32 2147483647, %v3511_v42 }
 0x664   : > { %v1690_v39 = vadd.f32 1.0, %v1682_v28  ;;  %v3524_v52 = vsel %vm1657_vm7, 1.0, %v2946_v31  ;;  %vm1656_vm8 = vcmp.ge.f32.partialorder %v3474_v10, 0.0  ;;  %v1804_v57 = vmul.f32 1.442695, %v1793_v40 }
 0x665   : > { %2818 = vrcp.f32 %v1691_v34  ;;  %v1792_v58 = vmul.f32 %v1784_v41, %v1672_v16  ;;  %v1685_v59 = vmul.f32 0.3275911, %v1677_v48  ;;  %v1676_v54 = vand.u32 2147483647, %v3514_v45 }
 0x666   : > { %2820 = vrcp.f32 %v1690_v39  ;;  %v1795_v6 = vmul.f32 %v1787_v46, %v1675_v26  ;;  %v1794_v7 = vmul.f32 %v1786_v47, %v1674_v9  ;;  %v1789_v16 = vsub.f32 0.0, %v1677_v48 }
 0x667   : > { %v3496_v30 = vpop.eup %2810  ;;  %2822 = vpow2.f32 %v1800_v38  ;;  %v1693_v12 = vadd.f32 1.0, %v1685_v59  ;;  %v1684_v62 = vmul.f32 0.3275911, %v1676_v54  ;;  %v1802_v15 = vmul.f32 1.442695, %v1792_v58 }
 0x668   : > { %v3506_v36 = vpop.eup %2812  ;;  %v1711_v37 = vmul.f32 1.0614054, %v3496_v30  ;;  %2824 = vpow2.f32 %v1798_v44  ;;  %v3540_v26 = vsel %vm1656_vm8, 1.0, %v2946_v31  ;;  %v1808_v13 = vmul.f32 1.442695, %v1795_v6 }
 0x669   : > { %v1710_v49 = vmul.f32 1.0614054, %v3506_v36  ;;  %2826 = vrcp.f32 %v1693_v12  ;;  %v1692_v20 = vadd.f32 1.0, %v1684_v62  ;;  %v1806_v9 = vmul.f32 1.442695, %v1794_v7 }
 0x66a   : > { %v1719_v43 = vadd.f32 -1.4531521, %v1711_v37  ;;  %2828 = vpow2.f32 %v1804_v57  ;;  %v1797_v34 = vmul.f32 %v1789_v16, %v1677_v48  ;;  %v1788_v44 = vsub.f32 0.0, %v1676_v54 }
 0x66b   : > { %v3518_v50 = vpop.eup %2814  ;;  %v1718_v1 = vadd.f32 -1.4531521, %v1710_v49  ;;  %2830 = vrcp.f32 %v1692_v20  ;;  %vm1659_vm9 = vcmp.ge.f32.partialorder %v3483_v23, 0.0  ;;  %vm1658_vm10 = vcmp.ge.f32.partialorder %v3486_v25, 0.0 }
 0x66c   : > { %v1727_v51 = vmul.f32 %v3496_v30, %v1719_v43  ;;  %v1713_v3 = vmul.f32 1.0614054, %v3518_v50  ;;  %v3529_v5 = vpop.eup %2816  ;;  %2832 = vpow2.f32 %v1802_v15  ;;  %v1812_v59 = vmul.f32 1.442695, %v1797_v34 }
 0x66d   : > { %v1726_v14 = vmul.f32 %v3506_v36, %v1718_v1  ;;  %v1712_v55 = vmul.f32 1.0614054, %v3529_v5  ;;  %2834 = vpow2.f32 %v1808_v13  ;;  %v1643_v25 = vmul.f32 0.5, %v3478_v17 }
 0x66e   : > { %v1735_v60 = vadd.f32 1.4214138, %v1727_v51  ;;  %v1721_v56 = vadd.f32 -1.4531521, %v1713_v3  ;;  %2836 = vpow2.f32 %v1806_v9  ;;  %vm1661_vm11 = vcmp.ge.f32.partialorder %v3511_v42, 0.0 }
 0x66f   : > { %v1734_v8 = vadd.f32 1.4214138, %v1726_v14  ;;  %v1720_v2 = vadd.f32 -1.4531521, %v1712_v55  ;;  %v3535_v11 = vpop.eup %2818  ;;  %2838 = vpow2.f32 %v1812_v59  ;;  %vm1660_vm12 = vcmp.ge.f32.partialorder %v3514_v45, 0.0 }
 0x670   : > { %v1743_v53 = vmul.f32 %v3496_v30, %v1735_v60  ;;  %v1729_v24 = vmul.f32 %v3518_v50, %v1721_v56  ;;  %v3542_v27 = vpop.eup %2820  ;;  %v1715_v39 = vmul.f32 1.0614054, %v3535_v11  ;;  %v1668_v17 = vsel %vm1660_vm12, 1.0, %v2946_v31  ;;  %v2340_v45 = vld [vmem:[%s721_s26] ss:$0 sm:$0xff] }
 0x671   : > { %v1742_v19 = vmul.f32 %v3506_v36, %v1734_v8  ;;  %v1728_v28 = vmul.f32 %v3529_v5, %v1720_v2  ;;  %v1714_v38 = vmul.f32 1.0614054, %v3542_v27  ;;  %v2823_v10 = vpop.eup %2822 }
 0x672   : > { %v1751_v63 = vadd.f32 -0.28449672, %v1743_v53  ;;  %v1737_v37 = vadd.f32 1.4214138, %v1729_v24  ;;  %v1723_v49 = vadd.f32 -1.4531521, %v1715_v39  ;;  %v2825_v51 = vpop.eup %2824  ;;  %v1796_v53 = vmul.f32 %v1788_v44, %v1676_v54 }
 0x673   : > { %v1750_v41 = vadd.f32 -0.28449672, %v1742_v19  ;;  %v1736_v43 = vadd.f32 1.4214138, %v1728_v28  ;;  %v1722_v47 = vadd.f32 -1.4531521, %v1714_v38  ;;  %v3555_v62 = vpop.eup %2826 }
 0x674   : > { %v1759_v21 = vmul.f32 %v3496_v30, %v1751_v63  ;;  %v1745_v46 = vmul.f32 %v3518_v50, %v1737_v37  ;;  %v1731_v3 = vmul.f32 %v3535_v11, %v1723_v49  ;;  %v1717_v20 = vmul.f32 1.0614054, %v3555_v62  ;;  %v2829_v63 = vpop.eup %2828 }
 0x675   : > { %v1758_v48 = vmul.f32 %v3506_v36, %v1750_v41  ;;  %v1744_v58 = vmul.f32 %v3529_v5, %v1736_v43  ;;  %v1730_v1 = vmul.f32 %v3542_v27, %v1722_v47  ;;  %v3563_v13 = vpop.eup %2830  ;;  %v1810_v39 = vmul.f32 1.442695, %v1796_v53 }
 0x676   : > { %v1767_v40 = vadd.f32 0.2548296, %v1759_v21  ;;  %v1753_v60 = vadd.f32 -0.28449672, %v1745_v46  ;;  %v1739_v55 = vadd.f32 1.4214138, %v1731_v3  ;;  %v2833_v38 = vpop.eup %2832 }
 0x677   : > { %v1766_v7 = vadd.f32 0.2548296, %v1758_v48  ;;  %v1752_v12 = vadd.f32 -0.28449672, %v1744_v58  ;;  %v1738_v14 = vadd.f32 1.4214138, %v1730_v1  ;;  %v2835_v47 = vpop.eup %2834  ;;  %2840 = vpow2.f32 %v1810_v39 }
 0x678   : > { %v1775_v57 = vmul.f32 %v3496_v30, %v1767_v40  ;;  %v1761_v30 = vmul.f32 %v3518_v50, %v1753_v60  ;;  %v1747_v24 = vmul.f32 %v3535_v11, %v1739_v55  ;;  %v1725_v19 = vadd.f32 -1.4531521, %v1717_v20 }
 0x679   : > { %v1774_v15 = vmul.f32 %v3506_v36, %v1766_v7  ;;  %v1760_v16 = vmul.f32 %v3529_v5, %v1752_v12  ;;  %v1746_v2 = vmul.f32 %v3542_v27, %v1738_v14  ;;  %v1716_v37 = vmul.f32 1.0614054, %v3563_v13 }
 0x67a   : > { %v1815_v6 = vmul.f32 %v2823_v10, %v1775_v57  ;;  %v1769_v8 = vadd.f32 0.2548296, %v1761_v30  ;;  %v1755_v34 = vadd.f32 -0.28449672, %v1747_v24 }
 0x67b   : > { %v1814_v9 = vmul.f32 %v2825_v51, %v1774_v15  ;;  %v1768_v21 = vadd.f32 0.2548296, %v1760_v16  ;;  %v1754_v28 = vadd.f32 -0.28449672, %v1746_v2  ;;  %v1724_v46 = vadd.f32 -1.4531521, %v1716_v37 }
 0x67c   : > { %v1823_v56 = vsub.f32 1.0, %v1815_v6  ;;  %v1777_v36 = vmul.f32 %v3518_v50, %v1769_v8  ;;  %v1763_v44 = vmul.f32 %v3535_v11, %v1755_v34  ;;  %v1641_v2 = vmul.f32 0.5, %v3466_v61 }
 0x67d   : > { %v1822_v10 = vsub.f32 1.0, %v1814_v9  ;;  %v1776_v40 = vmul.f32 %v3529_v5, %v1768_v21  ;;  %v1762_v43 = vmul.f32 %v3542_v27, %v1754_v28  ;;  %v1732_v60 = vmul.f32 %v3563_v13, %v1724_v46  ;;  %v2837_v5 = vpop.eup %2836 }
 0x67e   : > { %v1831_v54 = vmul.f32 %v1823_v56, %v3499_v32  ;;  %v1733_v32 = vmul.f32 %v3555_v62, %v1725_v19  ;;  %v1817_v41 = vmul.f32 %v2829_v63, %v1777_v36  ;;  %v1771_v59 = vadd.f32 0.2548296, %v1763_v44  ;;  %v2839_v15 = vpop.eup %2838 }
 0x67f   : > { %v1830_v50 = vmul.f32 %v1822_v10, %v3502_v33  ;;  %v1816_v51 = vmul.f32 %v2833_v38, %v1776_v40  ;;  %v1770_v58 = vadd.f32 0.2548296, %v1762_v43  ;;  %v1740_v33 = vadd.f32 1.4214138, %v1732_v60  ;;  %v2842_v60 = vld [vmem:[#allocation2 + $0x8] sm:$0xff] }
 0x680   : > { %v1839_v49 = vadd.f32 1.0, %v1831_v54  ;;  %v1741_v57 = vadd.f32 1.4214138, %v1733_v32  ;;  %v1825_v48 = vsub.f32 1.0, %v1817_v41  ;;  %v1779_v53 = vmul.f32 %v3535_v11, %v1771_v59 }
 0x681   : > { %v1838_v1 = vadd.f32 1.0, %v1830_v50  ;;  %v1824_v3 = vsub.f32 1.0, %v1816_v51  ;;  %v1778_v12 = vmul.f32 %v3542_v27, %v1770_v58  ;;  %v1748_v8 = vmul.f32 %v3563_v13, %v1740_v33  ;;  %v2841_v39 = vpop.eup %2840  ;;  %v2845_v33 = vld [vmem:[#allocation2 + $0x10] sm:$0xff] }
 0x682   : > { %v1749_v6 = vmul.f32 %v3555_v62, %v1741_v57  ;;  %v1833_v7 = vmul.f32 %v1825_v48, %v3524_v52  ;;  %v1847_v30 = vmul.f32 %v1839_v49, %v3490_v18  ;;  %v1819_v63 = vmul.f32 %v2835_v47, %v1779_v53 }
 0x683   : > { %v1846_v14 = vmul.f32 %v1838_v1, %v3492_v22  ;;  %v1832_v55 = vmul.f32 %v1824_v3, %v3540_v26  ;;  %v1818_v20 = vmul.f32 %v2837_v5, %v1778_v12  ;;  %v1640_v52 = vmul.f32 0.5, %v3468_v4  ;;  %v2843_v1 = vld [vmem:[#allocation2] sm:$0xff]  ;;  %v2844_v12 = vld [vmem:[#allocation2 + $0x18] sm:$0xff] }
 0x684   : > { %v1757_v56 = vadd.f32 -0.28449672, %v1749_v6  ;;  %v1841_v16 = vadd.f32 1.0, %v1833_v7  ;;  %v1827_v22 = vsub.f32 1.0, %v1819_v63  ;;  %v1756_v24 = vadd.f32 -0.28449672, %v1748_v8 }
 0x685   : > { %2579 = vmatprep.mubr.f32.mxu1 %v1846_v14  ;;  %v1840_v27 = vadd.f32 1.0, %v1832_v55  ;;  %v1826_v18 = vsub.f32 1.0, %v1818_v20  ;;  %v1667_v26 = vsel %vm1659_vm9, 1.0, %v2946_v31  ;;  %v1666_v54 = vsel %vm1658_vm10, 1.0, %v2946_v31  ;;  %v2847_v63 = vld [vmem:[#allocation2 + $0x20] sm:$0xff] }
 0x686   : > { %v1765_v11 = vmul.f32 %v3555_v62, %v1757_v56  ;;  %2580 = vmatmul.mubr.f32.vlgmr.msra.gmra.mrb[8].mxu1 %v1847_v30  ;;  %v1849_v21 = vmul.f32 %v1841_v16, %v1641_v2  ;;  %v1835_v36 = vmul.f32 %v1827_v22, %v1667_v26  ;;  %v1764_v28 = vmul.f32 %v3563_v13, %v1756_v24  ;;  %v2846_v16 = vld [vmem:[#allocation2 + $0x28] sm:$0xff]  ;;  %v2849_v24 = vld [vmem:[#allocation2 + $0x30] sm:$0xff] }
 0x687   : > { %v1848_v9 = vmul.f32 %v1840_v27, %v1640_v52  ;;  %v1834_v19 = vmul.f32 %v1826_v18, %v1666_v54  ;;  %v1642_v34 = vmul.f32 0.5, %v3480_v0  ;;  %v1669_v44 = vsel %vm1661_vm11, 1.0, %v2946_v31  ;;  %v2848_v18 = vld [vmem:[#allocation2 + $0x38] sm:$0xff]  ;;  %v2025_v54 = vld [vmem:[%s3765_s19] sm:$0xff] (!%p2341_p1) }
 0x688   : > { %v1773_v4 = vadd.f32 0.2548296, %v1765_v11  ;;  %v1843_v23 = vadd.f32 1.0, %v1835_v36  ;;  %v1772_v38 = vadd.f32 0.2548296, %v1764_v28  ;;  %v1644_v49 = vmul.f32 0.5, %v3504_v35 }
 0x689   : > { %2582 = vmatprep.mubr.f32.mxu1 %v1848_v9  ;;  %v1842_v37 = vadd.f32 1.0, %v1834_v19  ;;  %v2026_v9 = vld [vmem:[%s3765_s19 + $0x8] sm:$0xff] (!%p2341_p1)  ;;  %v2028_v36 = vld [vmem:[%s3765_s19 + $0x18] sm:$0xff] (!%p2341_p1)  ;;  %v2949_v28 = vmov (!%p2341_p1), 0.0  }
 0x68a   : > { %v1781_v61 = vmul.f32 %v3555_v62, %v1773_v4  ;;  %2583 = vmatmul.mubr.f32.gmra.mrb[10].mxu1 %v1849_v21  ;;  %v1780_v32 = vmul.f32 %v3563_v13, %v1772_v38  ;;  %v1851_v41 = vmul.f32 %v1843_v23, %v1643_v25  ;;  %v1645_v13 = vmul.f32 0.5, %v3494_v29  ;;  %v2027_v4 = vld [vmem:[%s3765_s19 + $0x10] sm:$0xff] (!%p2341_p1)  ;;  %2599 = vmatprep.mubr.msk.f32.mxu0 (!%p2341_p1), %vm2948_vm13, %v2949_v28 }
 0x68b   : > { %v1850_v40 = vmul.f32 %v1842_v37, %v1642_v34  ;;  %v2947_v21 = vmov (!%p2341_p1), 0.0|0.0   ;;  %v2691_v19 = vpack.c.bf16 (!%p2341_p1), %v2026_v9, %v2025_v54  ;;  %v2694_v38 = vpack.c.bf16 (!%p2341_p1), %v2028_v36, %v2027_v4 }
 0x68c   : > { %v1821_v10 = vmul.f32 %v2839_v15, %v1781_v61  ;;  %v1820_v0 = vmul.f32 %v2841_v39, %v1780_v32  ;;  %2690 = vmatprep.subr.bf16.mxu0 (!%p2341_p1), %v2947_v21 }
 0x68d   : > { %2585 = vmatprep.mubr.f32.mxu1 %v1850_v40  ;;  %2692 = vmatpush3.bf16.msra.mxu0 (!%p2341_p1), %v2691_v19 }
 0x68e   : > { %v1829_v43 = vsub.f32 1.0, %v1821_v10  ;;  %2586 = vmatmul.mubr.f32.gmra.mrb[12].mxu1 %v1851_v41  ;;  %v1828_v46 = vsub.f32 1.0, %v1820_v0  ;;  %2693 = vmatprep.subr.bf16.mxu0 (!%p2341_p1), %v2947_v21 }
 0x690   : > { %v1837_v62 = vmul.f32 %v1829_v43, %v1669_v44  ;;  %v1836_v47 = vmul.f32 %v1828_v46, %v1668_v17 }
 0x691   : > { %2695 = vmatpush3.bf16.msra.mxu0 (!%p2341_p1), %v2694_v38 }
 0x692   : > { %v1845_v42 = vadd.f32 1.0, %v1837_v62  ;;  %v1844_v50 = vadd.f32 1.0, %v1836_v47 }
 0x694   : > { %v1852_v51 = vmul.f32 %v1844_v50, %v1644_v49  ;;  %v1853_v57 = vmul.f32 %v1845_v42, %v1645_v13 }
 0x696   : > { %2588 = vmatprep.mubr.f32.mxu1 %v1852_v51 }
 0x697   : > { %2589 = vmatmul.mubr.f32.gmra.mrb[14].mxu1 %v1853_v57  ;;  %v2029_v57 = vld [vmem:[%s3766_s5] sm:$0x1] (!%p2341_p1) }
 0x759   : > { %v2581_v48 = vpop.f32.mrb[8].mxu1 }
 0x75a   : > { %v1949_v58 = vadd.f32 %v2581_v48, %v2340_v45  ;;  %v1943_v59 = vpop.f32.mrb[9].mxu1 }
 0x75b   : > { %v1944_v31 = vadd.f32 %v2340_v45, %v1943_v59 }
 0x75c   : > { %v1983_v5 = vadd.f32 %v2842_v60, %v1949_v58 }
 0x75d   : > { %v1982_v35 = vadd.f32 %v2843_v1, %v1944_v31  ;;  %v2584_v3 = vpop.f32.mrb[10].mxu1 }
 0x75e   : > { %1991 = vst.msk [vmem:[#allocation2 + $0x8] sm:$0xff] %vm896_vm2, %v1983_v5  ;;  %v1959_v29 = vadd.f32 %v2584_v3, %v2340_v45  ;;  %v1953_v6 = vpop.f32.mrb[11].mxu1  ;;  %v2003_v34 = vsel (!%p2341_p1), %vm896_vm2, %v1983_v5, 0.0 }
 0x75f   : > { %1990 = vst.msk [vmem:[#allocation2] sm:$0xff] %vm896_vm2, %v1982_v35  ;;  %v1954_v7 = vadd.f32 %v2340_v45, %v1953_v6  ;;  %v2002_v61 = vsel (!%p2341_p1), %vm896_vm2, %v1982_v35, 0.0 }
 0x760   : > { %v1985_v53 = vadd.f32 %v2844_v12, %v1959_v29  ;;  %v2004_v23 = vadd.f32 (!%p2341_p1), %v2003_v34, %v2002_v61 }
 0x761   : > { %v1984_v30 = vadd.f32 %v2845_v33, %v1954_v7  ;;  %v2587_v14 = vpop.f32.mrb[12].mxu1 }
 0x762   : > { %1993 = vst.msk [vmem:[#allocation2 + $0x18] sm:$0xff] %vm896_vm2, %v1985_v53  ;;  %v1969_v55 = vadd.f32 %v2587_v14, %v2340_v45  ;;  %v1963_v56 = vpop.f32.mrb[13].mxu1  ;;  %v2007_v39 = vsel (!%p2341_p1), %vm896_vm2, %v1985_v53, 0.0 }
 0x763   : > { %1992 = vst.msk [vmem:[#allocation2 + $0x10] sm:$0xff] %vm896_vm2, %v1984_v30  ;;  %v1964_v15 = vadd.f32 %v2340_v45, %v1963_v56  ;;  %v2005_v37 = vsel (!%p2341_p1), %vm896_vm2, %v1984_v30, 0.0 }
 0x764   : > { %v1987_v20 = vadd.f32 %v2846_v16, %v1969_v55  ;;  %v2006_v25 = vadd.f32 (!%p2341_p1), %v2005_v37, %v2004_v23 }
 0x765   : > { %v1986_v8 = vadd.f32 %v2847_v63, %v1964_v15 }
 0x766   : > { %1995 = vst.msk [vmem:[#allocation2 + $0x28] sm:$0xff] %vm896_vm2, %v1987_v20  ;;  %v2008_v40 = vadd.f32 (!%p2341_p1), %v2007_v39, %v2006_v25  ;;  %v2011_v32 = vsel (!%p2341_p1), %vm896_vm2, %v1987_v20, 0.0 }
 0x767   : > { %1994 = vst.msk [vmem:[#allocation2 + $0x20] sm:$0xff] %vm896_vm2, %v1986_v8  ;;  %v2009_v10 = vsel (!%p2341_p1), %vm896_vm2, %v1986_v8, 0.0 }
 0x768   : > { %v2010_v41 = vadd.f32 (!%p2341_p1), %v2009_v10, %v2008_v40 }
 0x76a   : > { %v2590_v52 = vpop.f32.mrb[14].mxu1  ;;  %2001 = sbr.rel (%p2341_p1) target bundleno = 2138 (0x85a), region = 96  ;;  %v2012_v44 = vadd.f32 (!%p2341_p1), %v2011_v32, %v2010_v41 }
 0x76b   : > { %v1979_v27 = vadd.f32 %v2590_v52, %v2340_v45  ;;  %v1973_v11 = vpop.f32.mrb[15].mxu1 }
 0x76c   : > { %v1974_v2 = vadd.f32 %v2340_v45, %v1973_v11 }
 0x76d   : > { %v1989_v22 = vadd.f32 %v2848_v18, %v1979_v27 }
 0x76e   : > { %v1988_v26 = vadd.f32 %v2849_v24, %v1974_v2 }
 0x76f   : > { %1997 = vst.msk [vmem:[#allocation2 + $0x38] sm:$0xff] %vm896_vm2, %v1989_v22  ;;  %v2015_v0 = vsel (!%p2341_p1), %vm896_vm2, %v1989_v22, 0.0 }
 0x770   : > { %1996 = vst.msk [vmem:[#allocation2 + $0x30] sm:$0xff] %vm896_vm2, %v1988_v26  ;;  %v2013_v43 = vsel (!%p2341_p1), %vm896_vm2, %v1988_v26, 0.0 }
 0x771   : > { %v2014_v62 = vadd.f32 %v2013_v43, %v2012_v44 }
 0x773   : > { %v2016_v46 = vadd.f32 %v2015_v0, %v2014_v62 }
 0x775   : > { %v2017_v17 = vrot.slane %v2016_v46, 4 }
 0x777   : > { %v2018_v47 = vadd.f32 %v2017_v17, %v2016_v46 }
 0x779   : > { %v2019_v42 = vrot.slane %v2018_v47, 2 }
 0x77b   : > { %v2020_v49 = vadd.f32 %v2019_v42, %v2018_v47 }
 0x77d   : > { %v2021_v50 = vrot.slane %v2020_v49, 1 }
 0x77f   : > { %v2022_v13 = vadd.f32 %v2021_v50, %v2020_v49 }
 0x781   : > { %v2024_v51 = vmul.f32 0.015625, %v2022_v13 }
 0x783   : > { %2600 = vmatmul.mubr.msk.f32.vlgmr.msra.gmra.mrb[0].mxu0 %vm896_vm2, %v2024_v51 }
 0x856   : > { %v2099_v45 = vpop.f32.mrb[0].mxu0 }
 0x857   : > { %v2100_v48 = vadd.f32 %v2099_v45, %v2029_v57  ;;  %v2601_v58 = vpop.f32.mrb[1].mxu0 }
 0x859   : > { %2104 = vst.msk [vmem:[%s3171_s30] sm:$0x1] %vm2103_vm14, %v2100_v48 }
 0x85a PF: > { %s3767_s21 = sld [smem:[#allocation8_spill]]  ;;  %s2118_s4 = sshll.u32 %s3171_s30, 4  ;;  %s2119_s4 = int_to_ptr.vmem [resolvable:$true] %s2118_s4 }
 0x85b   : > { %s3769_s26 = sld [smem:[#allocation25_spill]]  ;;  %s3771_s29 = sand.u32 1, %s2920_s25  }
 0x85c   : > { %s2106_s23 = scalar_lea.sflag [#allocation4], %s3771_s29  ;;  %s2850_s22 = scalar_lea.vmem %s2119_s4, 16 }
 0x85d   : > { %p2851_p2 = scmp.ne.s32.totalorder %s2119_s4, %s2850_s22  ;;  %s2950_s27 = smov [#allocation3]  }
 0x85e   : > { %s2854_s28 = sshll.u32 %s2950_s27, 4  ;;  %s2855_s28 = int_to_ptr.vmem [resolvable:$false] %s2854_s28 }
 0x85f   : > { %p2852_p4 = pnand %p2851_p2, %p3090_p3  ;;  %s2856_s5 = scalar_lea.vmem %s2855_s28, 32 }
 0x860   : > { %s2343_s15 = sshll.u32 %s3767_s21, 4  ;;  %p2857_p6 = scmp.lt.s32.totalorder %s2119_s4, %s2855_s28 }
 0x861   : > { %s3770_s3 = smov %s3769_s26  ;;  %s3647_s18 = scalar_lea.hbm %s3769_s26, %s2343_s15 }
 0x862   : > { %p2853_p5 = pneg %p2852_p4  ;;  %p2858_p7 = scmp.lt.s32.totalorder %s2856_s5, %s2850_s22 }
 0x864   : > { %p2859_p8 = por %p2858_p7, %p2857_p6 }
 0x866   : > { %p2860_p10 = pnand %p2859_p8, %p2853_p5 }
 0x868   : > { %2863 = shalt.err (!%p2860_p10)
}
 0x869   : > { %s2864_s30 = scalar_lea.hbm %s3647_s18, 16  ;;  %s2868_s0 = scalar_lea.hbm %s3770_s3, 32 }
 0x86a   : > { %p2865_p11 = scmp.ne.s32.totalorder %s3647_s18, %s2864_s30  ;;  %p2869_p0 = scmp.lt.u32.totalorder %s3647_s18, %s3770_s3 }
 0x86b   : > { %p2870_p1 = scmp.lt.u32.totalorder %s2868_s0, %s2864_s30  ;;  %p2872_p4 = scmp.lt.u32.totalorder %s2864_s30, %s3647_s18 }
 0x86c   : > { %p2866_p12 = pnand %p2865_p11, %p3090_p3 }
 0x86d   : > { %p2871_p2 = por %p2870_p1, %p2869_p0 }
 0x86e   : > { %p2867_p13 = pneg %p2866_p12 }
 0x86f   : > { %p2873_p5 = por %p2872_p4, %p2871_p2 }
 0x871   : > { %p2874_p6 = pnand %p2873_p5, %p2867_p13 }
 0x873   : > { %2877 = shalt.err (!%p2874_p6)
}
 0x874   : > { %2703 = dma.vmem_to_hbm [thread:$0]  (%p3090_p3), %s2119_s4, 16, %s3647_s18, %s2106_s23  }
 0x875 PF: > { %s3772_s29 = sld [smem:[#allocation11_spill]]  ;;  %s3773_s22 = sld [smem:[#allocation6_spill]] }
 0x87b   : > { %p2709_p7 = scmp.ge.s32.totalorder %s3772_s29, 2  ;;  %s2130_s28 = sand.u32 1, %s3773_s22  }
 0x87c   : > { %s2131_s5 = scalar_lea.sflag [#allocation4], %s2130_s28 }
 0x87d   : > { %p2706_p8 = pnand %p2709_p7, %p3100_p9 }
 0x87f   : > { %2911 = dma.done.wait (!%p2706_p8), %s2131_s5, 16  }
 0x880   : > { %2913 = vsyncadd (!%p2706_p8), %s2131_s5, 4294967280  ;;  %s30_s30 = sadd.s32 1, %s3772_s29   ;;  %s3775_s21 = sld [smem:[#allocation7_spill]] }
 0x881   : > { %p27_p10 = scmp.ge.s32.totalorder %s30_s30, 6   ;;  %s3776_s26 = sld [smem:[#allocation16_spill]] }
 0x882   : > { %s3777_s27 = sld [smem:[#allocation9_spill]]  ;;  %s3778_s28 = sld [smem:[#allocation10_spill]] }
 0x883   : > { %s3779_s29 = sld [smem:[#allocation12_spill]]  ;;  %s3780_s0 = sld [smem:[#allocation14_spill]] }
 0x884   : > { %s3781_s24 = smov %s2920_s25  ;;  %29 = sbr.rel (!%p27_p10) target bundleno = 14 (0xe), region = 161 }
 0x886   : > { %s3782_s25 = smov %s3775_s21 }
 0x88b   :  { %2135 = vsyncpa [#allocation4], 1 }
 0x88c   :  { %2137 = vsyncpa [#allocation4 + $0x1], 1 }

</bundles_post_ra>
